<compile_context>
chip_gen: v7x
topology: tpu7x:2x2x1
jax: 0.10.0
libtpu: 0.0.40
codegen_flags: <defaults>
</compile_context>

<pallas_src>
import math

import jax
import jax.numpy as jnp
from jax import lax
from jax.experimental import pallas as pl
from jax.experimental.pallas import tpu as pltpu  # noqa: F401  (TPU backend)

# ---------------- small but module-consistent hyper-parameters --------------
NUM_TOKENS  = 100
MAX_SEQ_LEN = 16
DIM         = 32
N_LAYERS    = 2
N_HEADS     = 4
FF_DIM      = 64
NUM_CLASSES = 4
PATCH       = 16
D_HEAD      = DIM // N_HEADS

BATCH       = 2
TOK_LEN     = 64                 # token sequence length, divisible by PATCH
NUM_PATCHES = TOK_LEN // PATCH
SEQ         = NUM_PATCHES + 1    # +1 for the CLS token

LN_EPS   = 1e-5
ATTN_EPS = 1e-6


# ---------------------------- kernel helpers ---------------------------------
def _layer_norm(x, g, b):
    mu = jnp.mean(x, axis=-1, keepdims=True)
    var = jnp.mean((x - mu) ** 2, axis=-1, keepdims=True)
    return (x - mu) * lax.rsqrt(var + LN_EPS) * g + b


def _elu_feature(x):
    # elu(x) + 1  ==  x+1 (x>0)  else  exp(x)
    return jnp.where(x > 0, x + 1.0, jnp.exp(x))


# -------------------- the single fused forward kernel ------------------------
def _fused_kernel(xp_ref, convw_ref, place_ref, add_ref,
                  cosf_ref, sinf_ref, prot_ref, bdiag_ref,
                  kmask_ref, rmask_ref,
                  wqkv_ref, bqkv_ref, wo_ref, vecs_ref,
                  w1_ref, b1_ref, w2_ref,
                  lnp_ref, outw_ref, outb_ref, sel_ref,
                  o_ref):
    f32 = jnp.float32
    D = prot_ref.shape[0]
    n_layers = wqkv_ref.shape[0]
    n_batch = kmask_ref.shape[0]

    cosf = cosf_ref[...]                       # [N*S, D]
    sinf = sinf_ref[...]                       # [N*S, D]
    prot = prot_ref[...]                       # [D, D] signed rotate-half perm
    bdiag = bdiag_ref[...]                     # [D, D] block-diag head mask

    # ---- patchifier (Conv1d k=stride=patch as matmul) + CLS + pos-emb ------
    patch = jnp.dot(xp_ref[...], convw_ref[...],
                    preferred_element_type=f32)                 # [N*P, D]
    x = jnp.dot(place_ref[...], patch,
                preferred_element_type=f32) + add_ref[...]      # [N*S, D]

    # ---- encoder layers (unrolled; weights VMEM-resident the whole time) ---
    for l in range(n_layers):
        vec = vecs_ref[l]                      # [6, D]: bo, g1, be1, b2, g2, be2
        bo, g1, be1 = vec[0:1], vec[1:2], vec[2:3]
        b2, g2, be2 = vec[3:4], vec[4:5], vec[5:6]

        # fused QKV projection
        qkv = jnp.dot(x, wqkv_ref[l],
                      preferred_element_type=f32) + bqkv_ref[l]   # [N*S, 3D]
        q = qkv[:, 0:D]
        k = qkv[:, D:2 * D]
        v = qkv[:, 2 * D:3 * D]

        # rotary (GPT-NeoX) on q/k: rotate_half == x @ prot (per-head signed perm)
        q = q * cosf + jnp.dot(q, prot, preferred_element_type=f32) * sinf
        k = k * cosf + jnp.dot(k, prot, preferred_element_type=f32) * sinf

        # linear attention (elu+1 feature map), all heads at once via the
        # block-diagonal head mask; tiny static loop over batch for the kv
        # reduction (keys of one batch element must not mix with another's).
        qf = _elu_feature(q)
        kf = _elu_feature(k)
        attn = jnp.zeros_like(qf)
        for b in range(n_batch):
            kfb = kf * kmask_ref[b]            # batch-b rows AND valid keys
            kv = lax.dot_general(kfb, v, (((0,), (0,)), ((), ())),
                                 preferred_element_type=f32) * bdiag   # [D, D]
            ksum = jnp.sum(kfb, axis=0, keepdims=True)                 # [1, D]
            num = jnp.dot(qf, kv, preferred_element_type=f32)          # [N*S, D]
            den = jnp.dot(qf * ksum, bdiag,
                          preferred_element_type=f32) + ATTN_EPS       # [N*S, D]
            attn = attn + rmask_ref[b] * (num / den)
        attn = jnp.dot(attn, wo_ref[l], preferred_element_type=f32) + bo

        # post-norm encoder block (fast_transformers style); dropout = identity
        x = x + attn
        xn = _layer_norm(x, g1, be1)
        y = jnp.dot(xn, w1_ref[l], preferred_element_type=f32) + b1_ref[l]
        y = jax.nn.gelu(y, approximate=True)
        y = jnp.dot(y, w2_ref[l], preferred_element_type=f32) + b2
        x = _layer_norm(xn + y, g2, be2)

    # ---- final LayerNorm + classifier head on the CLS rows -----------------
    lnp = lnp_ref[...]                                           # [2, D]
    xn = _layer_norm(x, lnp[0:1], lnp[1:2])
    cls = jnp.dot(sel_ref[...], xn, preferred_element_type=f32)  # [N, D]
    o_ref[...] = (jnp.dot(cls, outw_ref[...],
                          preferred_element_type=f32) + outb_ref[...])


# ------------------------------- parameters ----------------------------------
def init_params(key):
    ks = jax.random.split(key, 6 + N_LAYERS)
    f32 = jnp.float32
    p = {}
    # embedding / to_out follow init_weights(): U(-0.1, 0.1), zero bias
    p["embedding"] = jax.random.uniform(ks[0], (NUM_TOKENS, DIM), f32, -0.1, 0.1)
    conv_w = jax.random.normal(ks[1], (DIM, DIM, PATCH), f32) / math.sqrt(DIM * PATCH)
    # Conv1d weight [out, in, k]  ->  flattened [k*in, out] matching
    # x.reshape(N, P, patch, dim) flattening (k major, dim minor)
    p["conv_w_flat"] = jnp.transpose(conv_w, (2, 1, 0)).reshape(PATCH * DIM, DIM)
    p["conv_b"] = jnp.zeros((1, DIM), f32)
    p["pos_emb"] = jax.random.normal(ks[2], (MAX_SEQ_LEN, DIM), f32) * 0.02
    p["cls_token"] = jax.random.normal(ks[3], (1, 1, DIM), f32)
    p["ln_g"] = jnp.ones((1, DIM), f32)
    p["ln_b"] = jnp.zeros((1, DIM), f32)
    p["out_w"] = jax.random.uniform(ks[4], (DIM, NUM_CLASSES), f32, -0.1, 0.1)
    p["out_b"] = jnp.zeros((1, NUM_CLASSES), f32)

    s_d = 1.0 / math.sqrt(DIM)
    s_f = 1.0 / math.sqrt(FF_DIM)
    wqkv, bqkv, wo, vecs, w1, b1, w2 = [], [], [], [], [], [], []
    for l in range(N_LAYERS):
        lk = jax.random.split(ks[5 + l], 6)
        wq = jax.random.normal(lk[0], (DIM, DIM), f32) * s_d
        wk = jax.random.normal(lk[1], (DIM, DIM), f32) * s_d
        wv = jax.random.normal(lk[2], (DIM, DIM), f32) * s_d
        wqkv.append(jnp.concatenate([wq, wk, wv], axis=1))       # [D, 3D]
        bqkv.append(jnp.zeros((1, 3 * DIM), f32))
        wo.append(jax.random.normal(lk[3], (DIM, DIM), f32) * s_d)
        # packed per-layer D-wide vectors: rows = bo, g1, be1, b2, g2, be2
        vecs.append(jnp.stack([jnp.zeros((DIM,), f32),   # bo
                               jnp.ones((DIM,), f32),    # norm1 gamma
                               jnp.zeros((DIM,), f32),   # norm1 beta
                               jnp.zeros((DIM,), f32),   # b2
                               jnp.ones((DIM,), f32),    # norm2 gamma
                               jnp.zeros((DIM,), f32)])) # norm2 beta
        w1.append(jax.random.normal(lk[4], (DIM, FF_DIM), f32) * s_d)
        b1.append(jnp.zeros((1, FF_DIM), f32))
        w2.append(jax.random.normal(lk[5], (FF_DIM, DIM), f32) * s_f)
    p["wqkv"] = jnp.stack(wqkv)      # [L, D, 3D]
    p["bqkv"] = jnp.stack(bqkv)      # [L, 1, 3D]
    p["wo"]   = jnp.stack(wo)        # [L, D, D]
    p["vecs"] = jnp.stack(vecs)      # [L, 6, D]
    p["w1"]   = jnp.stack(w1)        # [L, D, FF]
    p["b1"]   = jnp.stack(b1)        # [L, 1, FF]
    p["w2"]   = jnp.stack(w2)        # [L, FF, D]
    return p


# ------------------------------ full forward ---------------------------------
def patch_classifier_forward(params, inputs, input_mask):
    N, L = inputs.shape
    assert L % PATCH == 0, "Input shape not divisible by patch size"
    P = L // PATCH
    S = P + 1
    f32 = jnp.float32

    # embedding lookup (data-dependent gather stays in plain JAX glue)
    x_emb = jnp.take(params["embedding"], inputs, axis=0)              # [N, L, D]
    xp = x_emb.reshape(N, P, PATCH, DIM).reshape(N * P, PATCH * DIM)   # [N*P, P*D]

    # additive table (CLS token + pos-emb on row 0, conv bias + pos-emb else),
    # tiled over batch -> [N*S, D]
    add_one = jnp.concatenate(
        [params["cls_token"].reshape(1, DIM) + params["pos_emb"][0:1],
         params["conv_b"] + params["pos_emb"][1:S]], axis=0)           # [S, D]
    add = jnp.tile(add_one, (N, 1))                                    # [N*S, D]

    # placement matrix: patch row (b*P+p) -> activation row (b*S+p+1)
    rows = jnp.arange(N * S)
    cols = jnp.arange(N * P)
    place = (((rows[:, None] // S) == (cols[None, :] // P)) &
             ((rows[:, None] % S) == (cols[None, :] % P + 1))).astype(f32)

    # CLS-row selection matrix: [N, N*S]
    sel = (rows[None, :] == (jnp.arange(N) * S)[:, None]).astype(f32)

    # LengthMask: mask_len = ceil((1 + sum(input_mask)) / patch_size)
    full_mask = jnp.concatenate(
        [jnp.ones((N, 1), f32), input_mask.astype(f32)], axis=1)
    mask_len = jnp.ceil(jnp.sum(full_mask, axis=-1) / PATCH)           # [N]
    key_mask = (jnp.arange(S, dtype=f32)[None, :]
                < mask_len[:, None]).astype(f32).reshape(N * S, 1)     # [N*S, 1]
    rmask = (rows[None, :] // S
             == jnp.arange(N)[:, None]).astype(f32)[..., None]         # [N, N*S, 1]
    kmask = rmask * key_mask[None, :, :]                               # [N, N*S, 1]

    # rotary tables (GPT-NeoX), tiled to model width and over batch
    t = jnp.arange(S, dtype=f32)
    inv_freq = 1.0 / (10000.0 ** (jnp.arange(0, D_HEAD, 2, dtype=f32) / D_HEAD))
    freqs = jnp.einsum("s,f->sf", t, inv_freq)
    emb = jnp.concatenate([freqs, freqs], axis=-1)                     # [S, d_head]
    cosf = jnp.tile(jnp.cos(emb), (N, N_HEADS))                        # [N*S, D]
    sinf = jnp.tile(jnp.sin(emb), (N, N_HEADS))

    # signed rotate-half permutation (per-head) and block-diagonal head mask
    d_idx = jnp.arange(DIM)
    head_of = d_idx // D_HEAD
    within = d_idx % D_HEAD
    half = D_HEAD // 2
    same_head = head_of[:, None] == head_of[None, :]
    prot = (jnp.where(same_head & (within[None, :] == within[:, None] + half),
                      1.0, 0.0)
            + jnp.where(same_head & (within[None, :] == within[:, None] - half),
                        -1.0, 0.0)).astype(f32)                        # [D, D]
    bdiag = same_head.astype(f32)                                      # [D, D]

    lnp = jnp.concatenate([params["ln_g"], params["ln_b"]], axis=0)    # [2, D]

    # one fused Pallas kernel for the whole forward; everything stays in VMEM
    return pl.pallas_call(
        _fused_kernel,
        out_shape=jax.ShapeDtypeStruct((N, NUM_CLASSES), f32),
    )(xp, params["conv_w_flat"], place, add, cosf, sinf, prot, bdiag,
      kmask, rmask,
      params["wqkv"], params["bqkv"], params["wo"], params["vecs"],
      params["w1"], params["b1"], params["w2"],
      lnp, params["out_w"], params["out_b"], sel)


# ---------------------------------- main --------------------------------------
if __name__ == "__main__":
    key = jax.random.PRNGKey(0)
    pk, ik = jax.random.split(key, 2)
    params = init_params(pk)

    inputs = jax.random.randint(ik, (BATCH, TOK_LEN), 0, NUM_TOKENS,
                                dtype=jnp.int32)
    lengths = jnp.array([TOK_LEN, 40], dtype=jnp.int32)
    input_mask = (jnp.arange(TOK_LEN)[None, :]
                  < lengths[:, None]).astype(jnp.float32)              # [N, L]

    out = jax.jit(patch_classifier_forward)(params, inputs, input_mask)
    out = jax.block_until_ready(out)
    assert out.shape == (BATCH, NUM_CLASSES)
    assert bool(jnp.all(jnp.isfinite(out)))
    print("KERNEL_OK")
</pallas_src>

<mosaic_0001>
module attributes {stable_mosaic.version = 11 : i64} {
  func.func @_fused_kernel(%arg0: memref<8x512xf32, #tpu.memory_space<vmem>>, %arg1: memref<512x32xf32, #tpu.memory_space<vmem>>, %arg2: memref<10x8xf32, #tpu.memory_space<vmem>>, %arg3: memref<10x32xf32, #tpu.memory_space<vmem>>, %arg4: memref<10x32xf32, #tpu.memory_space<vmem>>, %arg5: memref<10x32xf32, #tpu.memory_space<vmem>>, %arg6: memref<32x32xf32, #tpu.memory_space<vmem>>, %arg7: memref<32x32xf32, #tpu.memory_space<vmem>>, %arg8: memref<2x10x1xf32, #tpu.memory_space<vmem>>, %arg9: memref<2x10x1xf32, #tpu.memory_space<vmem>>, %arg10: memref<2x32x96xf32, #tpu.memory_space<vmem>>, %arg11: memref<2x1x96xf32, #tpu.memory_space<vmem>>, %arg12: memref<2x32x32xf32, #tpu.memory_space<vmem>>, %arg13: memref<2x6x32xf32, #tpu.memory_space<vmem>>, %arg14: memref<2x32x64xf32, #tpu.memory_space<vmem>>, %arg15: memref<2x1x64xf32, #tpu.memory_space<vmem>>, %arg16: memref<2x64x32xf32, #tpu.memory_space<vmem>>, %arg17: memref<2x32xf32, #tpu.memory_space<vmem>>, %arg18: memref<32x4xf32, #tpu.memory_space<vmem>>, %arg19: memref<1x4xf32, #tpu.memory_space<vmem>>, %arg20: memref<2x10xf32, #tpu.memory_space<vmem>>, %arg21: memref<2x4xf32, #tpu.memory_space<vmem>>) attributes {dimension_semantics = [], scalar_prefetch = 0 : i64, scratch_operands = 0 : i64, tpu.core_type = #tpu.core_type<tc>} {
    %c0 = arith.constant 0 : index
    %c0_0 = arith.constant 0 : index
    %0 = vector.load %arg4[%c0, %c0_0] : memref<10x32xf32, #tpu.memory_space<vmem>>, vector<10x32xf32>
    %c0_1 = arith.constant 0 : index
    %c0_2 = arith.constant 0 : index
    %1 = vector.load %arg5[%c0_1, %c0_2] : memref<10x32xf32, #tpu.memory_space<vmem>>, vector<10x32xf32>
    %c0_3 = arith.constant 0 : index
    %c0_4 = arith.constant 0 : index
    %2 = vector.load %arg6[%c0_3, %c0_4] : memref<32x32xf32, #tpu.memory_space<vmem>>, vector<32x32xf32>
    %c0_5 = arith.constant 0 : index
    %c0_6 = arith.constant 0 : index
    %3 = vector.load %arg7[%c0_5, %c0_6] : memref<32x32xf32, #tpu.memory_space<vmem>>, vector<32x32xf32>
    %c0_7 = arith.constant 0 : index
    %c0_8 = arith.constant 0 : index
    %4 = vector.load %arg0[%c0_7, %c0_8] : memref<8x512xf32, #tpu.memory_space<vmem>>, vector<8x512xf32>
    %c0_9 = arith.constant 0 : index
    %c0_10 = arith.constant 0 : index
    %5 = vector.load %arg1[%c0_9, %c0_10] : memref<512x32xf32, #tpu.memory_space<vmem>>, vector<512x32xf32>
    %cst = arith.constant dense<0.000000e+00> : vector<8x32xf32>
    %6 = tpu.matmul %4, %5, %cst {dimension_numbers = #tpu.dot_dimension_numbers<[1], [0], [0], [1], [0, 0, 1, 1], [], []>} : vector<8x512xf32>, vector<512x32xf32>, vector<8x32xf32> -> vector<8x32xf32>
    %c0_11 = arith.constant 0 : index
    %c0_12 = arith.constant 0 : index
    %7 = vector.load %arg2[%c0_11, %c0_12] : memref<10x8xf32, #tpu.memory_space<vmem>>, vector<10x8xf32>
    %cst_13 = arith.constant dense<0.000000e+00> : vector<10x32xf32>
    %8 = tpu.matmul %7, %6, %cst_13 {dimension_numbers = #tpu.dot_dimension_numbers<[1], [0], [0], [1], [0, 0, 1, 1], [], []>} : vector<10x8xf32>, vector<8x32xf32>, vector<10x32xf32> -> vector<10x32xf32>
    %c0_14 = arith.constant 0 : index
    %c0_15 = arith.constant 0 : index
    %9 = vector.load %arg3[%c0_14, %c0_15] : memref<10x32xf32, #tpu.memory_space<vmem>>, vector<10x32xf32>
    %10 = arith.addf %8, %9 : vector<10x32xf32>
    %c0_16 = arith.constant 0 : index
    %c0_17 = arith.constant 0 : index
    %c0_18 = arith.constant 0 : index
    %11 = vector.load %arg13[%c0_16, %c0_17, %c0_18] : memref<2x6x32xf32, #tpu.memory_space<vmem>>, vector<1x6x32xf32>
    %12 = vector.shape_cast %11 : vector<1x6x32xf32> to vector<6x32xf32>
    %13 = vector.extract_strided_slice %12 {offsets = [0, 0], sizes = [1, 32], strides = [1, 1]} : vector<6x32xf32> to vector<1x32xf32>
    %14 = vector.extract_strided_slice %12 {offsets = [1, 0], sizes = [1, 32], strides = [1, 1]} : vector<6x32xf32> to vector<1x32xf32>
    %15 = vector.extract_strided_slice %12 {offsets = [2, 0], sizes = [1, 32], strides = [1, 1]} : vector<6x32xf32> to vector<1x32xf32>
    %16 = vector.extract_strided_slice %12 {offsets = [3, 0], sizes = [1, 32], strides = [1, 1]} : vector<6x32xf32> to vector<1x32xf32>
    %17 = vector.extract_strided_slice %12 {offsets = [4, 0], sizes = [1, 32], strides = [1, 1]} : vector<6x32xf32> to vector<1x32xf32>
    %18 = vector.extract_strided_slice %12 {offsets = [5, 0], sizes = [1, 32], strides = [1, 1]} : vector<6x32xf32> to vector<1x32xf32>
    %c0_19 = arith.constant 0 : index
    %c0_20 = arith.constant 0 : index
    %c0_21 = arith.constant 0 : index
    %19 = vector.load %arg10[%c0_19, %c0_20, %c0_21] : memref<2x32x96xf32, #tpu.memory_space<vmem>>, vector<1x32x96xf32>
    %20 = vector.shape_cast %19 : vector<1x32x96xf32> to vector<32x96xf32>
    %cst_22 = arith.constant dense<0.000000e+00> : vector<10x96xf32>
    %21 = tpu.matmul %10, %20, %cst_22 {dimension_numbers = #tpu.dot_dimension_numbers<[1], [0], [0], [1], [0, 0, 1, 1], [], []>} : vector<10x32xf32>, vector<32x96xf32>, vector<10x96xf32> -> vector<10x96xf32>
    %c0_23 = arith.constant 0 : index
    %c0_24 = arith.constant 0 : index
    %c0_25 = arith.constant 0 : index
    %22 = vector.load %arg11[%c0_23, %c0_24, %c0_25] : memref<2x1x96xf32, #tpu.memory_space<vmem>>, vector<1x1x96xf32>
    %23 = vector.shape_cast %22 : vector<1x1x96xf32> to vector<1x96xf32>
    %24 = vector.broadcast %23 : vector<1x96xf32> to vector<10x96xf32>
    %25 = arith.addf %21, %24 : vector<10x96xf32>
    %26 = vector.extract_strided_slice %25 {offsets = [0, 0], sizes = [10, 32], strides = [1, 1]} : vector<10x96xf32> to vector<10x32xf32>
    %27 = vector.extract_strided_slice %25 {offsets = [0, 32], sizes = [10, 32], strides = [1, 1]} : vector<10x96xf32> to vector<10x32xf32>
    %28 = vector.extract_strided_slice %25 {offsets = [0, 64], sizes = [10, 32], strides = [1, 1]} : vector<10x96xf32> to vector<10x32xf32>
    %29 = arith.mulf %26, %0 : vector<10x32xf32>
    %cst_26 = arith.constant dense<0.000000e+00> : vector<10x32xf32>
    %30 = tpu.matmul %26, %2, %cst_26 {dimension_numbers = #tpu.dot_dimension_numbers<[1], [0], [0], [1], [0, 0, 1, 1], [], []>} : vector<10x32xf32>, vector<32x32xf32>, vector<10x32xf32> -> vector<10x32xf32>
    %31 = arith.mulf %30, %1 : vector<10x32xf32>
    %32 = arith.addf %29, %31 : vector<10x32xf32>
    %33 = arith.mulf %27, %0 : vector<10x32xf32>
    %cst_27 = arith.constant dense<0.000000e+00> : vector<10x32xf32>
    %34 = tpu.matmul %27, %2, %cst_27 {dimension_numbers = #tpu.dot_dimension_numbers<[1], [0], [0], [1], [0, 0, 1, 1], [], []>} : vector<10x32xf32>, vector<32x32xf32>, vector<10x32xf32> -> vector<10x32xf32>
    %35 = arith.mulf %34, %1 : vector<10x32xf32>
    %36 = arith.addf %33, %35 : vector<10x32xf32>
    %cst_28 = arith.constant 0.000000e+00 : f32
    %37 = vector.broadcast %cst_28 : f32 to vector<10x32xf32>
    %38 = arith.cmpf ogt, %32, %37 : vector<10x32xf32>
    %cst_29 = arith.constant 1.000000e+00 : f32
    %39 = vector.broadcast %cst_29 : f32 to vector<10x32xf32>
    %40 = arith.addf %32, %39 : vector<10x32xf32>
    %41 = math.exp %32 : vector<10x32xf32>
    %42 = arith.select %38, %40, %41 : vector<10x32xi1>, vector<10x32xf32>
    %cst_30 = arith.constant 0.000000e+00 : f32
    %43 = vector.broadcast %cst_30 : f32 to vector<10x32xf32>
    %44 = arith.cmpf ogt, %36, %43 : vector<10x32xf32>
    %cst_31 = arith.constant 1.000000e+00 : f32
    %45 = vector.broadcast %cst_31 : f32 to vector<10x32xf32>
    %46 = arith.addf %36, %45 : vector<10x32xf32>
    %47 = math.exp %36 : vector<10x32xf32>
    %48 = arith.select %44, %46, %47 : vector<10x32xi1>, vector<10x32xf32>
    %cst_32 = arith.constant 0.000000e+00 : f32
    %49 = vector.broadcast %cst_32 : f32 to vector<10x32xf32>
    %c0_33 = arith.constant 0 : index
    %c0_34 = arith.constant 0 : index
    %c0_35 = arith.constant 0 : index
    %50 = vector.load %arg8[%c0_33, %c0_34, %c0_35] : memref<2x10x1xf32, #tpu.memory_space<vmem>>, vector<1x10x1xf32>
    %51 = vector.shape_cast %50 : vector<1x10x1xf32> to vector<10x1xf32>
    %52 = vector.broadcast %51 : vector<10x1xf32> to vector<10x32xf32>
    %53 = arith.mulf %48, %52 : vector<10x32xf32>
    %cst_36 = arith.constant dense<0.000000e+00> : vector<32x32xf32>
    %54 = tpu.matmul %53, %28, %cst_36 {dimension_numbers = #tpu.dot_dimension_numbers<[0], [0], [1], [1], [0, 1, 1, 1], [], []>} : vector<10x32xf32>, vector<10x32xf32>, vector<32x32xf32> -> vector<32x32xf32>
    %55 = arith.mulf %54, %3 : vector<32x32xf32>
    %cst_37 = arith.constant dense<0.000000e+00> : vector<32xf32>
    %56 = vector.multi_reduction <add>, %53, %cst_37 [0] : vector<10x32xf32> to vector<32xf32>
    %57 = vector.shape_cast %56 : vector<32xf32> to vector<1x32xf32>
    %cst_38 = arith.constant dense<0.000000e+00> : vector<10x32xf32>
    %58 = tpu.matmul %42, %55, %cst_38 {dimension_numbers = #tpu.dot_dimension_numbers<[1], [0], [0], [1], [0, 0, 1, 1], [], []>} : vector<10x32xf32>, vector<32x32xf32>, vector<10x32xf32> -> vector<10x32xf32>
    %59 = vector.broadcast %57 : vector<1x32xf32> to vector<10x32xf32>
    %60 = arith.mulf %42, %59 : vector<10x32xf32>
    %cst_39 = arith.constant dense<0.000000e+00> : vector<10x32xf32>
    %61 = tpu.matmul %60, %3, %cst_39 {dimension_numbers = #tpu.dot_dimension_numbers<[1], [0], [0], [1], [0, 0, 1, 1], [], []>} : vector<10x32xf32>, vector<32x32xf32>, vector<10x32xf32> -> vector<10x32xf32>
    %cst_40 = arith.constant 9.99999997E-7 : f32
    %62 = vector.broadcast %cst_40 : f32 to vector<10x32xf32>
    %63 = arith.addf %61, %62 : vector<10x32xf32>
    %c0_41 = arith.constant 0 : index
    %c0_42 = arith.constant 0 : index
    %c0_43 = arith.constant 0 : index
    %64 = vector.load %arg9[%c0_41, %c0_42, %c0_43] : memref<2x10x1xf32, #tpu.memory_space<vmem>>, vector<1x10x1xf32>
    %65 = vector.shape_cast %64 : vector<1x10x1xf32> to vector<10x1xf32>
    %66 = arith.divf %58, %63 : vector<10x32xf32>
    %67 = vector.broadcast %65 : vector<10x1xf32> to vector<10x32xf32>
    %68 = arith.mulf %67, %66 : vector<10x32xf32>
    %69 = arith.addf %49, %68 : vector<10x32xf32>
    %c1 = arith.constant 1 : index
    %c0_44 = arith.constant 0 : index
    %c0_45 = arith.constant 0 : index
    %70 = vector.load %arg8[%c1, %c0_44, %c0_45] : memref<2x10x1xf32, #tpu.memory_space<vmem>>, vector<1x10x1xf32>
    %71 = vector.shape_cast %70 : vector<1x10x1xf32> to vector<10x1xf32>
    %72 = vector.broadcast %71 : vector<10x1xf32> to vector<10x32xf32>
    %73 = arith.mulf %48, %72 : vector<10x32xf32>
    %cst_46 = arith.constant dense<0.000000e+00> : vector<32x32xf32>
    %74 = tpu.matmul %73, %28, %cst_46 {dimension_numbers = #tpu.dot_dimension_numbers<[0], [0], [1], [1], [0, 1, 1, 1], [], []>} : vector<10x32xf32>, vector<10x32xf32>, vector<32x32xf32> -> vector<32x32xf32>
    %75 = arith.mulf %74, %3 : vector<32x32xf32>
    %cst_47 = arith.constant dense<0.000000e+00> : vector<32xf32>
    %76 = vector.multi_reduction <add>, %73, %cst_47 [0] : vector<10x32xf32> to vector<32xf32>
    %77 = vector.shape_cast %76 : vector<32xf32> to vector<1x32xf32>
    %cst_48 = arith.constant dense<0.000000e+00> : vector<10x32xf32>
    %78 = tpu.matmul %42, %75, %cst_48 {dimension_numbers = #tpu.dot_dimension_numbers<[1], [0], [0], [1], [0, 0, 1, 1], [], []>} : vector<10x32xf32>, vector<32x32xf32>, vector<10x32xf32> -> vector<10x32xf32>
    %79 = vector.broadcast %77 : vector<1x32xf32> to vector<10x32xf32>
    %80 = arith.mulf %42, %79 : vector<10x32xf32>
    %cst_49 = arith.constant dense<0.000000e+00> : vector<10x32xf32>
    %81 = tpu.matmul %80, %3, %cst_49 {dimension_numbers = #tpu.dot_dimension_numbers<[1], [0], [0], [1], [0, 0, 1, 1], [], []>} : vector<10x32xf32>, vector<32x32xf32>, vector<10x32xf32> -> vector<10x32xf32>
    %cst_50 = arith.constant 9.99999997E-7 : f32
    %82 = vector.broadcast %cst_50 : f32 to vector<10x32xf32>
    %83 = arith.addf %81, %82 : vector<10x32xf32>
    %c1_51 = arith.constant 1 : index
    %c0_52 = arith.constant 0 : index
    %c0_53 = arith.constant 0 : index
    %84 = vector.load %arg9[%c1_51, %c0_52, %c0_53] : memref<2x10x1xf32, #tpu.memory_space<vmem>>, vector<1x10x1xf32>
    %85 = vector.shape_cast %84 : vector<1x10x1xf32> to vector<10x1xf32>
    %86 = arith.divf %78, %83 : vector<10x32xf32>
    %87 = vector.broadcast %85 : vector<10x1xf32> to vector<10x32xf32>
    %88 = arith.mulf %87, %86 : vector<10x32xf32>
    %89 = arith.addf %69, %88 : vector<10x32xf32>
    %c0_54 = arith.constant 0 : index
    %c0_55 = arith.constant 0 : index
    %c0_56 = arith.constant 0 : index
    %90 = vector.load %arg12[%c0_54, %c0_55, %c0_56] : memref<2x32x32xf32, #tpu.memory_space<vmem>>, vector<1x32x32xf32>
    %91 = vector.shape_cast %90 : vector<1x32x32xf32> to vector<32x32xf32>
    %cst_57 = arith.constant dense<0.000000e+00> : vector<10x32xf32>
    %92 = tpu.matmul %89, %91, %cst_57 {dimension_numbers = #tpu.dot_dimension_numbers<[1], [0], [0], [1], [0, 0, 1, 1], [], []>} : vector<10x32xf32>, vector<32x32xf32>, vector<10x32xf32> -> vector<10x32xf32>
    %93 = vector.broadcast %13 : vector<1x32xf32> to vector<10x32xf32>
    %94 = arith.addf %92, %93 : vector<10x32xf32>
    %95 = arith.addf %10, %94 : vector<10x32xf32>
    %cst_58 = arith.constant dense<0.000000e+00> : vector<10xf32>
    %96 = vector.multi_reduction <add>, %95, %cst_58 [1] : vector<10x32xf32> to vector<10xf32>
    %97 = vector.shape_cast %96 : vector<10xf32> to vector<10x1xf32>
    %cst_59 = arith.constant 3.200000e+01 : f32
    %98 = vector.broadcast %cst_59 : f32 to vector<10x1xf32>
    %99 = arith.divf %97, %98 : vector<10x1xf32>
    %100 = vector.broadcast %99 : vector<10x1xf32> to vector<10x32xf32>
    %101 = arith.subf %95, %100 : vector<10x32xf32>
    %102 = arith.mulf %101, %101 : vector<10x32xf32>
    %cst_60 = arith.constant dense<0.000000e+00> : vector<10xf32>
    %103 = vector.multi_reduction <add>, %102, %cst_60 [1] : vector<10x32xf32> to vector<10xf32>
    %104 = vector.shape_cast %103 : vector<10xf32> to vector<10x1xf32>
    %cst_61 = arith.constant 3.200000e+01 : f32
    %105 = vector.broadcast %cst_61 : f32 to vector<10x1xf32>
    %106 = arith.divf %104, %105 : vector<10x1xf32>
    %107 = vector.broadcast %99 : vector<10x1xf32> to vector<10x32xf32>
    %108 = arith.subf %95, %107 : vector<10x32xf32>
    %cst_62 = arith.constant 9.99999974E-6 : f32
    %109 = vector.broadcast %cst_62 : f32 to vector<10x1xf32>
    %110 = arith.addf %106, %109 : vector<10x1xf32>
    %111 = math.rsqrt %110 : vector<10x1xf32>
    %112 = vector.broadcast %111 : vector<10x1xf32> to vector<10x32xf32>
    %113 = arith.mulf %108, %112 : vector<10x32xf32>
    %114 = vector.broadcast %14 : vector<1x32xf32> to vector<10x32xf32>
    %115 = arith.mulf %113, %114 : vector<10x32xf32>
    %116 = vector.broadcast %15 : vector<1x32xf32> to vector<10x32xf32>
    %117 = arith.addf %115, %116 : vector<10x32xf32>
    %c0_63 = arith.constant 0 : index
    %c0_64 = arith.constant 0 : index
    %c0_65 = arith.constant 0 : index
    %118 = vector.load %arg14[%c0_63, %c0_64, %c0_65] : memref<2x32x64xf32, #tpu.memory_space<vmem>>, vector<1x32x64xf32>
    %119 = vector.shape_cast %118 : vector<1x32x64xf32> to vector<32x64xf32>
    %cst_66 = arith.constant dense<0.000000e+00> : vector<10x64xf32>
    %120 = tpu.matmul %117, %119, %cst_66 {dimension_numbers = #tpu.dot_dimension_numbers<[1], [0], [0], [1], [0, 0, 1, 1], [], []>} : vector<10x32xf32>, vector<32x64xf32>, vector<10x64xf32> -> vector<10x64xf32>
    %c0_67 = arith.constant 0 : index
    %c0_68 = arith.constant 0 : index
    %c0_69 = arith.constant 0 : index
    %121 = vector.load %arg15[%c0_67, %c0_68, %c0_69] : memref<2x1x64xf32, #tpu.memory_space<vmem>>, vector<1x1x64xf32>
    %122 = vector.shape_cast %121 : vector<1x1x64xf32> to vector<1x64xf32>
    %123 = vector.broadcast %122 : vector<1x64xf32> to vector<10x64xf32>
    %124 = arith.addf %120, %123 : vector<10x64xf32>
    %125 = arith.mulf %124, %124 : vector<10x64xf32>
    %126 = arith.mulf %124, %125 : vector<10x64xf32>
    %cst_70 = arith.constant 4.471500e-02 : f32
    %127 = vector.broadcast %cst_70 : f32 to vector<10x64xf32>
    %128 = arith.mulf %127, %126 : vector<10x64xf32>
    %129 = arith.addf %124, %128 : vector<10x64xf32>
    %cst_71 = arith.constant 0.797884583 : f32
    %130 = vector.broadcast %cst_71 : f32 to vector<10x64xf32>
    %131 = arith.mulf %130, %129 : vector<10x64xf32>
    %132 = math.tanh %131 : vector<10x64xf32>
    %cst_72 = arith.constant 1.000000e+00 : f32
    %133 = vector.broadcast %cst_72 : f32 to vector<10x64xf32>
    %134 = arith.addf %133, %132 : vector<10x64xf32>
    %cst_73 = arith.constant 5.000000e-01 : f32
    %135 = vector.broadcast %cst_73 : f32 to vector<10x64xf32>
    %136 = arith.mulf %135, %134 : vector<10x64xf32>
    %137 = arith.mulf %124, %136 : vector<10x64xf32>
    %c0_74 = arith.constant 0 : index
    %c0_75 = arith.constant 0 : index
    %c0_76 = arith.constant 0 : index
    %138 = vector.load %arg16[%c0_74, %c0_75, %c0_76] : memref<2x64x32xf32, #tpu.memory_space<vmem>>, vector<1x64x32xf32>
    %139 = vector.shape_cast %138 : vector<1x64x32xf32> to vector<64x32xf32>
    %cst_77 = arith.constant dense<0.000000e+00> : vector<10x32xf32>
    %140 = tpu.matmul %137, %139, %cst_77 {dimension_numbers = #tpu.dot_dimension_numbers<[1], [0], [0], [1], [0, 0, 1, 1], [], []>} : vector<10x64xf32>, vector<64x32xf32>, vector<10x32xf32> -> vector<10x32xf32>
    %141 = vector.broadcast %16 : vector<1x32xf32> to vector<10x32xf32>
    %142 = arith.addf %140, %141 : vector<10x32xf32>
    %143 = arith.addf %117, %142 : vector<10x32xf32>
    %cst_78 = arith.constant dense<0.000000e+00> : vector<10xf32>
    %144 = vector.multi_reduction <add>, %143, %cst_78 [1] : vector<10x32xf32> to vector<10xf32>
    %145 = vector.shape_cast %144 : vector<10xf32> to vector<10x1xf32>
    %cst_79 = arith.constant 3.200000e+01 : f32
    %146 = vector.broadcast %cst_79 : f32 to vector<10x1xf32>
    %147 = arith.divf %145, %146 : vector<10x1xf32>
    %148 = vector.broadcast %147 : vector<10x1xf32> to vector<10x32xf32>
    %149 = arith.subf %143, %148 : vector<10x32xf32>
    %150 = arith.mulf %149, %149 : vector<10x32xf32>
    %cst_80 = arith.constant dense<0.000000e+00> : vector<10xf32>
    %151 = vector.multi_reduction <add>, %150, %cst_80 [1] : vector<10x32xf32> to vector<10xf32>
    %152 = vector.shape_cast %151 : vector<10xf32> to vector<10x1xf32>
    %cst_81 = arith.constant 3.200000e+01 : f32
    %153 = vector.broadcast %cst_81 : f32 to vector<10x1xf32>
    %154 = arith.divf %152, %153 : vector<10x1xf32>
    %155 = vector.broadcast %147 : vector<10x1xf32> to vector<10x32xf32>
    %156 = arith.subf %143, %155 : vector<10x32xf32>
    %cst_82 = arith.constant 9.99999974E-6 : f32
    %157 = vector.broadcast %cst_82 : f32 to vector<10x1xf32>
    %158 = arith.addf %154, %157 : vector<10x1xf32>
    %159 = math.rsqrt %158 : vector<10x1xf32>
    %160 = vector.broadcast %159 : vector<10x1xf32> to vector<10x32xf32>
    %161 = arith.mulf %156, %160 : vector<10x32xf32>
    %162 = vector.broadcast %17 : vector<1x32xf32> to vector<10x32xf32>
    %163 = arith.mulf %161, %162 : vector<10x32xf32>
    %164 = vector.broadcast %18 : vector<1x32xf32> to vector<10x32xf32>
    %165 = arith.addf %163, %164 : vector<10x32xf32>
    %c1_83 = arith.constant 1 : index
    %c0_84 = arith.constant 0 : index
    %c0_85 = arith.constant 0 : index
    %166 = vector.load %arg13[%c1_83, %c0_84, %c0_85] : memref<2x6x32xf32, #tpu.memory_space<vmem>>, vector<1x6x32xf32>
    %167 = vector.shape_cast %166 : vector<1x6x32xf32> to vector<6x32xf32>
    %168 = vector.extract_strided_slice %167 {offsets = [0, 0], sizes = [1, 32], strides = [1, 1]} : vector<6x32xf32> to vector<1x32xf32>
    %169 = vector.extract_strided_slice %167 {offsets = [1, 0], sizes = [1, 32], strides = [1, 1]} : vector<6x32xf32> to vector<1x32xf32>
    %170 = vector.extract_strided_slice %167 {offsets = [2, 0], sizes = [1, 32], strides = [1, 1]} : vector<6x32xf32> to vector<1x32xf32>
    %171 = vector.extract_strided_slice %167 {offsets = [3, 0], sizes = [1, 32], strides = [1, 1]} : vector<6x32xf32> to vector<1x32xf32>
    %172 = vector.extract_strided_slice %167 {offsets = [4, 0], sizes = [1, 32], strides = [1, 1]} : vector<6x32xf32> to vector<1x32xf32>
    %173 = vector.extract_strided_slice %167 {offsets = [5, 0], sizes = [1, 32], strides = [1, 1]} : vector<6x32xf32> to vector<1x32xf32>
    %c1_86 = arith.constant 1 : index
    %c0_87 = arith.constant 0 : index
    %c0_88 = arith.constant 0 : index
    %174 = vector.load %arg10[%c1_86, %c0_87, %c0_88] : memref<2x32x96xf32, #tpu.memory_space<vmem>>, vector<1x32x96xf32>
    %175 = vector.shape_cast %174 : vector<1x32x96xf32> to vector<32x96xf32>
    %cst_89 = arith.constant dense<0.000000e+00> : vector<10x96xf32>
    %176 = tpu.matmul %165, %175, %cst_89 {dimension_numbers = #tpu.dot_dimension_numbers<[1], [0], [0], [1], [0, 0, 1, 1], [], []>} : vector<10x32xf32>, vector<32x96xf32>, vector<10x96xf32> -> vector<10x96xf32>
    %c1_90 = arith.constant 1 : index
    %c0_91 = arith.constant 0 : index
    %c0_92 = arith.constant 0 : index
    %177 = vector.load %arg11[%c1_90, %c0_91, %c0_92] : memref<2x1x96xf32, #tpu.memory_space<vmem>>, vector<1x1x96xf32>
    %178 = vector.shape_cast %177 : vector<1x1x96xf32> to vector<1x96xf32>
    %179 = vector.broadcast %178 : vector<1x96xf32> to vector<10x96xf32>
    %180 = arith.addf %176, %179 : vector<10x96xf32>
    %181 = vector.extract_strided_slice %180 {offsets = [0, 0], sizes = [10, 32], strides = [1, 1]} : vector<10x96xf32> to vector<10x32xf32>
    %182 = vector.extract_strided_slice %180 {offsets = [0, 32], sizes = [10, 32], strides = [1, 1]} : vector<10x96xf32> to vector<10x32xf32>
    %183 = vector.extract_strided_slice %180 {offsets = [0, 64], sizes = [10, 32], strides = [1, 1]} : vector<10x96xf32> to vector<10x32xf32>
    %184 = arith.mulf %181, %0 : vector<10x32xf32>
    %cst_93 = arith.constant dense<0.000000e+00> : vector<10x32xf32>
    %185 = tpu.matmul %181, %2, %cst_93 {dimension_numbers = #tpu.dot_dimension_numbers<[1], [0], [0], [1], [0, 0, 1, 1], [], []>} : vector<10x32xf32>, vector<32x32xf32>, vector<10x32xf32> -> vector<10x32xf32>
    %186 = arith.mulf %185, %1 : vector<10x32xf32>
    %187 = arith.addf %184, %186 : vector<10x32xf32>
    %188 = arith.mulf %182, %0 : vector<10x32xf32>
    %cst_94 = arith.constant dense<0.000000e+00> : vector<10x32xf32>
    %189 = tpu.matmul %182, %2, %cst_94 {dimension_numbers = #tpu.dot_dimension_numbers<[1], [0], [0], [1], [0, 0, 1, 1], [], []>} : vector<10x32xf32>, vector<32x32xf32>, vector<10x32xf32> -> vector<10x32xf32>
    %190 = arith.mulf %189, %1 : vector<10x32xf32>
    %191 = arith.addf %188, %190 : vector<10x32xf32>
    %cst_95 = arith.constant 0.000000e+00 : f32
    %192 = vector.broadcast %cst_95 : f32 to vector<10x32xf32>
    %193 = arith.cmpf ogt, %187, %192 : vector<10x32xf32>
    %cst_96 = arith.constant 1.000000e+00 : f32
    %194 = vector.broadcast %cst_96 : f32 to vector<10x32xf32>
    %195 = arith.addf %187, %194 : vector<10x32xf32>
    %196 = math.exp %187 : vector<10x32xf32>
    %197 = arith.select %193, %195, %196 : vector<10x32xi1>, vector<10x32xf32>
    %cst_97 = arith.constant 0.000000e+00 : f32
    %198 = vector.broadcast %cst_97 : f32 to vector<10x32xf32>
    %199 = arith.cmpf ogt, %191, %198 : vector<10x32xf32>
    %cst_98 = arith.constant 1.000000e+00 : f32
    %200 = vector.broadcast %cst_98 : f32 to vector<10x32xf32>
    %201 = arith.addf %191, %200 : vector<10x32xf32>
    %202 = math.exp %191 : vector<10x32xf32>
    %203 = arith.select %199, %201, %202 : vector<10x32xi1>, vector<10x32xf32>
    %cst_99 = arith.constant 0.000000e+00 : f32
    %204 = vector.broadcast %cst_99 : f32 to vector<10x32xf32>
    %c0_100 = arith.constant 0 : index
    %c0_101 = arith.constant 0 : index
    %c0_102 = arith.constant 0 : index
    %205 = vector.load %arg8[%c0_100, %c0_101, %c0_102] : memref<2x10x1xf32, #tpu.memory_space<vmem>>, vector<1x10x1xf32>
    %206 = vector.shape_cast %205 : vector<1x10x1xf32> to vector<10x1xf32>
    %207 = vector.broadcast %206 : vector<10x1xf32> to vector<10x32xf32>
    %208 = arith.mulf %203, %207 : vector<10x32xf32>
    %cst_103 = arith.constant dense<0.000000e+00> : vector<32x32xf32>
    %209 = tpu.matmul %208, %183, %cst_103 {dimension_numbers = #tpu.dot_dimension_numbers<[0], [0], [1], [1], [0, 1, 1, 1], [], []>} : vector<10x32xf32>, vector<10x32xf32>, vector<32x32xf32> -> vector<32x32xf32>
    %210 = arith.mulf %209, %3 : vector<32x32xf32>
    %cst_104 = arith.constant dense<0.000000e+00> : vector<32xf32>
    %211 = vector.multi_reduction <add>, %208, %cst_104 [0] : vector<10x32xf32> to vector<32xf32>
    %212 = vector.shape_cast %211 : vector<32xf32> to vector<1x32xf32>
    %cst_105 = arith.constant dense<0.000000e+00> : vector<10x32xf32>
    %213 = tpu.matmul %197, %210, %cst_105 {dimension_numbers = #tpu.dot_dimension_numbers<[1], [0], [0], [1], [0, 0, 1, 1], [], []>} : vector<10x32xf32>, vector<32x32xf32>, vector<10x32xf32> -> vector<10x32xf32>
    %214 = vector.broadcast %212 : vector<1x32xf32> to vector<10x32xf32>
    %215 = arith.mulf %197, %214 : vector<10x32xf32>
    %cst_106 = arith.constant dense<0.000000e+00> : vector<10x32xf32>
    %216 = tpu.matmul %215, %3, %cst_106 {dimension_numbers = #tpu.dot_dimension_numbers<[1], [0], [0], [1], [0, 0, 1, 1], [], []>} : vector<10x32xf32>, vector<32x32xf32>, vector<10x32xf32> -> vector<10x32xf32>
    %cst_107 = arith.constant 9.99999997E-7 : f32
    %217 = vector.broadcast %cst_107 : f32 to vector<10x32xf32>
    %218 = arith.addf %216, %217 : vector<10x32xf32>
    %c0_108 = arith.constant 0 : index
    %c0_109 = arith.constant 0 : index
    %c0_110 = arith.constant 0 : index
    %219 = vector.load %arg9[%c0_108, %c0_109, %c0_110] : memref<2x10x1xf32, #tpu.memory_space<vmem>>, vector<1x10x1xf32>
    %220 = vector.shape_cast %219 : vector<1x10x1xf32> to vector<10x1xf32>
    %221 = arith.divf %213, %218 : vector<10x32xf32>
    %222 = vector.broadcast %220 : vector<10x1xf32> to vector<10x32xf32>
    %223 = arith.mulf %222, %221 : vector<10x32xf32>
    %224 = arith.addf %204, %223 : vector<10x32xf32>
    %c1_111 = arith.constant 1 : index
    %c0_112 = arith.constant 0 : index
    %c0_113 = arith.constant 0 : index
    %225 = vector.load %arg8[%c1_111, %c0_112, %c0_113] : memref<2x10x1xf32, #tpu.memory_space<vmem>>, vector<1x10x1xf32>
    %226 = vector.shape_cast %225 : vector<1x10x1xf32> to vector<10x1xf32>
    %227 = vector.broadcast %226 : vector<10x1xf32> to vector<10x32xf32>
    %228 = arith.mulf %203, %227 : vector<10x32xf32>
    %cst_114 = arith.constant dense<0.000000e+00> : vector<32x32xf32>
    %229 = tpu.matmul %228, %183, %cst_114 {dimension_numbers = #tpu.dot_dimension_numbers<[0], [0], [1], [1], [0, 1, 1, 1], [], []>} : vector<10x32xf32>, vector<10x32xf32>, vector<32x32xf32> -> vector<32x32xf32>
    %230 = arith.mulf %229, %3 : vector<32x32xf32>
    %cst_115 = arith.constant dense<0.000000e+00> : vector<32xf32>
    %231 = vector.multi_reduction <add>, %228, %cst_115 [0] : vector<10x32xf32> to vector<32xf32>
    %232 = vector.shape_cast %231 : vector<32xf32> to vector<1x32xf32>
    %cst_116 = arith.constant dense<0.000000e+00> : vector<10x32xf32>
    %233 = tpu.matmul %197, %230, %cst_116 {dimension_numbers = #tpu.dot_dimension_numbers<[1], [0], [0], [1], [0, 0, 1, 1], [], []>} : vector<10x32xf32>, vector<32x32xf32>, vector<10x32xf32> -> vector<10x32xf32>
    %234 = vector.broadcast %232 : vector<1x32xf32> to vector<10x32xf32>
    %235 = arith.mulf %197, %234 : vector<10x32xf32>
    %cst_117 = arith.constant dense<0.000000e+00> : vector<10x32xf32>
    %236 = tpu.matmul %235, %3, %cst_117 {dimension_numbers = #tpu.dot_dimension_numbers<[1], [0], [0], [1], [0, 0, 1, 1], [], []>} : vector<10x32xf32>, vector<32x32xf32>, vector<10x32xf32> -> vector<10x32xf32>
    %cst_118 = arith.constant 9.99999997E-7 : f32
    %237 = vector.broadcast %cst_118 : f32 to vector<10x32xf32>
    %238 = arith.addf %236, %237 : vector<10x32xf32>
    %c1_119 = arith.constant 1 : index
    %c0_120 = arith.constant 0 : index
    %c0_121 = arith.constant 0 : index
    %239 = vector.load %arg9[%c1_119, %c0_120, %c0_121] : memref<2x10x1xf32, #tpu.memory_space<vmem>>, vector<1x10x1xf32>
    %240 = vector.shape_cast %239 : vector<1x10x1xf32> to vector<10x1xf32>
    %241 = arith.divf %233, %238 : vector<10x32xf32>
    %242 = vector.broadcast %240 : vector<10x1xf32> to vector<10x32xf32>
    %243 = arith.mulf %242, %241 : vector<10x32xf32>
    %244 = arith.addf %224, %243 : vector<10x32xf32>
    %c1_122 = arith.constant 1 : index
    %c0_123 = arith.constant 0 : index
    %c0_124 = arith.constant 0 : index
    %245 = vector.load %arg12[%c1_122, %c0_123, %c0_124] : memref<2x32x32xf32, #tpu.memory_space<vmem>>, vector<1x32x32xf32>
    %246 = vector.shape_cast %245 : vector<1x32x32xf32> to vector<32x32xf32>
    %cst_125 = arith.constant dense<0.000000e+00> : vector<10x32xf32>
    %247 = tpu.matmul %244, %246, %cst_125 {dimension_numbers = #tpu.dot_dimension_numbers<[1], [0], [0], [1], [0, 0, 1, 1], [], []>} : vector<10x32xf32>, vector<32x32xf32>, vector<10x32xf32> -> vector<10x32xf32>
    %248 = vector.broadcast %168 : vector<1x32xf32> to vector<10x32xf32>
    %249 = arith.addf %247, %248 : vector<10x32xf32>
    %250 = arith.addf %165, %249 : vector<10x32xf32>
    %cst_126 = arith.constant dense<0.000000e+00> : vector<10xf32>
    %251 = vector.multi_reduction <add>, %250, %cst_126 [1] : vector<10x32xf32> to vector<10xf32>
    %252 = vector.shape_cast %251 : vector<10xf32> to vector<10x1xf32>
    %cst_127 = arith.constant 3.200000e+01 : f32
    %253 = vector.broadcast %cst_127 : f32 to vector<10x1xf32>
    %254 = arith.divf %252, %253 : vector<10x1xf32>
    %255 = vector.broadcast %254 : vector<10x1xf32> to vector<10x32xf32>
    %256 = arith.subf %250, %255 : vector<10x32xf32>
    %257 = arith.mulf %256, %256 : vector<10x32xf32>
    %cst_128 = arith.constant dense<0.000000e+00> : vector<10xf32>
    %258 = vector.multi_reduction <add>, %257, %cst_128 [1] : vector<10x32xf32> to vector<10xf32>
    %259 = vector.shape_cast %258 : vector<10xf32> to vector<10x1xf32>
    %cst_129 = arith.constant 3.200000e+01 : f32
    %260 = vector.broadcast %cst_129 : f32 to vector<10x1xf32>
    %261 = arith.divf %259, %260 : vector<10x1xf32>
    %262 = vector.broadcast %254 : vector<10x1xf32> to vector<10x32xf32>
    %263 = arith.subf %250, %262 : vector<10x32xf32>
    %cst_130 = arith.constant 9.99999974E-6 : f32
    %264 = vector.broadcast %cst_130 : f32 to vector<10x1xf32>
    %265 = arith.addf %261, %264 : vector<10x1xf32>
    %266 = math.rsqrt %265 : vector<10x1xf32>
    %267 = vector.broadcast %266 : vector<10x1xf32> to vector<10x32xf32>
    %268 = arith.mulf %263, %267 : vector<10x32xf32>
    %269 = vector.broadcast %169 : vector<1x32xf32> to vector<10x32xf32>
    %270 = arith.mulf %268, %269 : vector<10x32xf32>
    %271 = vector.broadcast %170 : vector<1x32xf32> to vector<10x32xf32>
    %272 = arith.addf %270, %271 : vector<10x32xf32>
    %c1_131 = arith.constant 1 : index
    %c0_132 = arith.constant 0 : index
    %c0_133 = arith.constant 0 : index
    %273 = vector.load %arg14[%c1_131, %c0_132, %c0_133] : memref<2x32x64xf32, #tpu.memory_space<vmem>>, vector<1x32x64xf32>
    %274 = vector.shape_cast %273 : vector<1x32x64xf32> to vector<32x64xf32>
    %cst_134 = arith.constant dense<0.000000e+00> : vector<10x64xf32>
    %275 = tpu.matmul %272, %274, %cst_134 {dimension_numbers = #tpu.dot_dimension_numbers<[1], [0], [0], [1], [0, 0, 1, 1], [], []>} : vector<10x32xf32>, vector<32x64xf32>, vector<10x64xf32> -> vector<10x64xf32>
    %c1_135 = arith.constant 1 : index
    %c0_136 = arith.constant 0 : index
    %c0_137 = arith.constant 0 : index
    %276 = vector.load %arg15[%c1_135, %c0_136, %c0_137] : memref<2x1x64xf32, #tpu.memory_space<vmem>>, vector<1x1x64xf32>
    %277 = vector.shape_cast %276 : vector<1x1x64xf32> to vector<1x64xf32>
    %278 = vector.broadcast %277 : vector<1x64xf32> to vector<10x64xf32>
    %279 = arith.addf %275, %278 : vector<10x64xf32>
    %280 = arith.mulf %279, %279 : vector<10x64xf32>
    %281 = arith.mulf %279, %280 : vector<10x64xf32>
    %cst_138 = arith.constant 4.471500e-02 : f32
    %282 = vector.broadcast %cst_138 : f32 to vector<10x64xf32>
    %283 = arith.mulf %282, %281 : vector<10x64xf32>
    %284 = arith.addf %279, %283 : vector<10x64xf32>
    %cst_139 = arith.constant 0.797884583 : f32
    %285 = vector.broadcast %cst_139 : f32 to vector<10x64xf32>
    %286 = arith.mulf %285, %284 : vector<10x64xf32>
    %287 = math.tanh %286 : vector<10x64xf32>
    %cst_140 = arith.constant 1.000000e+00 : f32
    %288 = vector.broadcast %cst_140 : f32 to vector<10x64xf32>
    %289 = arith.addf %288, %287 : vector<10x64xf32>
    %cst_141 = arith.constant 5.000000e-01 : f32
    %290 = vector.broadcast %cst_141 : f32 to vector<10x64xf32>
    %291 = arith.mulf %290, %289 : vector<10x64xf32>
    %292 = arith.mulf %279, %291 : vector<10x64xf32>
    %c1_142 = arith.constant 1 : index
    %c0_143 = arith.constant 0 : index
    %c0_144 = arith.constant 0 : index
    %293 = vector.load %arg16[%c1_142, %c0_143, %c0_144] : memref<2x64x32xf32, #tpu.memory_space<vmem>>, vector<1x64x32xf32>
    %294 = vector.shape_cast %293 : vector<1x64x32xf32> to vector<64x32xf32>
    %cst_145 = arith.constant dense<0.000000e+00> : vector<10x32xf32>
    %295 = tpu.matmul %292, %294, %cst_145 {dimension_numbers = #tpu.dot_dimension_numbers<[1], [0], [0], [1], [0, 0, 1, 1], [], []>} : vector<10x64xf32>, vector<64x32xf32>, vector<10x32xf32> -> vector<10x32xf32>
    %296 = vector.broadcast %171 : vector<1x32xf32> to vector<10x32xf32>
    %297 = arith.addf %295, %296 : vector<10x32xf32>
    %298 = arith.addf %272, %297 : vector<10x32xf32>
    %cst_146 = arith.constant dense<0.000000e+00> : vector<10xf32>
    %299 = vector.multi_reduction <add>, %298, %cst_146 [1] : vector<10x32xf32> to vector<10xf32>
    %300 = vector.shape_cast %299 : vector<10xf32> to vector<10x1xf32>
    %cst_147 = arith.constant 3.200000e+01 : f32
    %301 = vector.broadcast %cst_147 : f32 to vector<10x1xf32>
    %302 = arith.divf %300, %301 : vector<10x1xf32>
    %303 = vector.broadcast %302 : vector<10x1xf32> to vector<10x32xf32>
    %304 = arith.subf %298, %303 : vector<10x32xf32>
    %305 = arith.mulf %304, %304 : vector<10x32xf32>
    %cst_148 = arith.constant dense<0.000000e+00> : vector<10xf32>
    %306 = vector.multi_reduction <add>, %305, %cst_148 [1] : vector<10x32xf32> to vector<10xf32>
    %307 = vector.shape_cast %306 : vector<10xf32> to vector<10x1xf32>
    %cst_149 = arith.constant 3.200000e+01 : f32
    %308 = vector.broadcast %cst_149 : f32 to vector<10x1xf32>
    %309 = arith.divf %307, %308 : vector<10x1xf32>
    %310 = vector.broadcast %302 : vector<10x1xf32> to vector<10x32xf32>
    %311 = arith.subf %298, %310 : vector<10x32xf32>
    %cst_150 = arith.constant 9.99999974E-6 : f32
    %312 = vector.broadcast %cst_150 : f32 to vector<10x1xf32>
    %313 = arith.addf %309, %312 : vector<10x1xf32>
    %314 = math.rsqrt %313 : vector<10x1xf32>
    %315 = vector.broadcast %314 : vector<10x1xf32> to vector<10x32xf32>
    %316 = arith.mulf %311, %315 : vector<10x32xf32>
    %317 = vector.broadcast %172 : vector<1x32xf32> to vector<10x32xf32>
    %318 = arith.mulf %316, %317 : vector<10x32xf32>
    %319 = vector.broadcast %173 : vector<1x32xf32> to vector<10x32xf32>
    %320 = arith.addf %318, %319 : vector<10x32xf32>
    %c0_151 = arith.constant 0 : index
    %c0_152 = arith.constant 0 : index
    %321 = vector.load %arg17[%c0_151, %c0_152] : memref<2x32xf32, #tpu.memory_space<vmem>>, vector<2x32xf32>
    %322 = vector.extract_strided_slice %321 {offsets = [0, 0], sizes = [1, 32], strides = [1, 1]} : vector<2x32xf32> to vector<1x32xf32>
    %323 = vector.extract_strided_slice %321 {offsets = [1, 0], sizes = [1, 32], strides = [1, 1]} : vector<2x32xf32> to vector<1x32xf32>
    %cst_153 = arith.constant dense<0.000000e+00> : vector<10xf32>
    %324 = vector.multi_reduction <add>, %320, %cst_153 [1] : vector<10x32xf32> to vector<10xf32>
    %325 = vector.shape_cast %324 : vector<10xf32> to vector<10x1xf32>
    %cst_154 = arith.constant 3.200000e+01 : f32
    %326 = vector.broadcast %cst_154 : f32 to vector<10x1xf32>
    %327 = arith.divf %325, %326 : vector<10x1xf32>
    %328 = vector.broadcast %327 : vector<10x1xf32> to vector<10x32xf32>
    %329 = arith.subf %320, %328 : vector<10x32xf32>
    %330 = arith.mulf %329, %329 : vector<10x32xf32>
    %cst_155 = arith.constant dense<0.000000e+00> : vector<10xf32>
    %331 = vector.multi_reduction <add>, %330, %cst_155 [1] : vector<10x32xf32> to vector<10xf32>
    %332 = vector.shape_cast %331 : vector<10xf32> to vector<10x1xf32>
    %cst_156 = arith.constant 3.200000e+01 : f32
    %333 = vector.broadcast %cst_156 : f32 to vector<10x1xf32>
    %334 = arith.divf %332, %333 : vector<10x1xf32>
    %335 = vector.broadcast %327 : vector<10x1xf32> to vector<10x32xf32>
    %336 = arith.subf %320, %335 : vector<10x32xf32>
    %cst_157 = arith.constant 9.99999974E-6 : f32
    %337 = vector.broadcast %cst_157 : f32 to vector<10x1xf32>
    %338 = arith.addf %334, %337 : vector<10x1xf32>
    %339 = math.rsqrt %338 : vector<10x1xf32>
    %340 = vector.broadcast %339 : vector<10x1xf32> to vector<10x32xf32>
    %341 = arith.mulf %336, %340 : vector<10x32xf32>
    %342 = vector.broadcast %322 : vector<1x32xf32> to vector<10x32xf32>
    %343 = arith.mulf %341, %342 : vector<10x32xf32>
    %344 = vector.broadcast %323 : vector<1x32xf32> to vector<10x32xf32>
    %345 = arith.addf %343, %344 : vector<10x32xf32>
    %c0_158 = arith.constant 0 : index
    %c0_159 = arith.constant 0 : index
    %346 = vector.load %arg20[%c0_158, %c0_159] : memref<2x10xf32, #tpu.memory_space<vmem>>, vector<2x10xf32>
    %cst_160 = arith.constant dense<0.000000e+00> : vector<2x32xf32>
    %347 = tpu.matmul %346, %345, %cst_160 {dimension_numbers = #tpu.dot_dimension_numbers<[1], [0], [0], [1], [0, 0, 1, 1], [], []>} : vector<2x10xf32>, vector<10x32xf32>, vector<2x32xf32> -> vector<2x32xf32>
    %c0_161 = arith.constant 0 : index
    %c0_162 = arith.constant 0 : index
    %348 = vector.load %arg18[%c0_161, %c0_162] : memref<32x4xf32, #tpu.memory_space<vmem>>, vector<32x4xf32>
    %cst_163 = arith.constant dense<0.000000e+00> : vector<2x4xf32>
    %349 = tpu.matmul %347, %348, %cst_163 {dimension_numbers = #tpu.dot_dimension_numbers<[1], [0], [0], [1], [0, 0, 1, 1], [], []>} : vector<2x32xf32>, vector<32x4xf32>, vector<2x4xf32> -> vector<2x4xf32>
    %c0_164 = arith.constant 0 : index
    %c0_165 = arith.constant 0 : index
    %350 = vector.load %arg19[%c0_164, %c0_165] : memref<1x4xf32, #tpu.memory_space<vmem>>, vector<1x4xf32>
    %351 = vector.broadcast %350 : vector<1x4xf32> to vector<2x4xf32>
    %352 = arith.addf %349, %351 : vector<2x4xf32>
    %c0_166 = arith.constant 0 : index
    %c0_167 = arith.constant 0 : index
    %353 = vector.load %arg21[%c0_166, %c0_167] : memref<2x4xf32, #tpu.memory_space<vmem>>, vector<2x4xf32>
    tpu.vector_store %arg21[%c0_166, %c0_167], %352 {strides = array<i32>} : memref<2x4xf32, #tpu.memory_space<vmem>>, vector<2x4xf32>,
    return
  }
}

</mosaic_0001>

<bundles_post_ra>
// kernel: tile.19
= control target key start
LH: loop header
LB: loop body
LE: loop exit
PB: predicated region body
PF: predicated region fallthrough
CT: control target
= control target key end

     0   :  { %vm3_vm0 = vcmask 261120   ;;  %s34_s0 = inlined_call_operand.vmem [shape: f32[2,5,32], index: 0, kind: input, shape index: {}]   ;;  %s35_s1 = inlined_call_operand.vmem [shape: f32[10,32], index: 1, kind: output, shape index: {}]  }
   0x1   :  { %v2_v0 = vld [vmem:[%s34_s0] sm:$0x1f]   ;;  %v10_v1 = vld [vmem:[%s34_s0 + $0x8] sm:$0x1f]  }
   0x2   :  { %4 = vst.msk [vmem:[%s35_s1] sm:$0x1f] %vm3_vm0, %v2_v0   ;;  %11 = vst.msk [vmem:[%s35_s1 + $0x5] sm:$0x1f] %vm3_vm0, %v10_v1  }

// kernel: tile.28
= control target key start
LH: loop header
LB: loop body
LE: loop exit
PB: predicated region body
PF: predicated region fallthrough
CT: control target
= control target key end

     0   :  { %s100_s0 = inlined_call_operand.vmem [shape: f32[5,8], index: 0, kind: input, shape index: {}]   ;;  %s101_s1 = inlined_call_operand.vmem [shape: f32[2,5,4,8], index: 1, kind: output, shape index: {}]  }
   0x1   :  { %v4_v0 = vld [vmem:[%s100_s0] ss:$0 sm:$0xff]  ;;  %v33_v1 = vld [vmem:[%s100_s0 + $0x1] ss:$0 sm:$0xff]  ;;  %v36_v2 = vld [vmem:[%s100_s0 + $0x2] ss:$0 sm:$0xff] }
   0x2   :  { %5 = vst [vmem:[%s101_s1] sm:$0xf] %v4_v0  ;;  %32 = vst [vmem:[%s101_s1 + $0x14] sm:$0xf] %v4_v0  ;;  %v39_v3 = vld [vmem:[%s100_s0 + $0x3] ss:$0 sm:$0xff] }
   0x3   :  { %34 = vst [vmem:[%s101_s1 + $0x4] sm:$0xf] %v33_v1  ;;  %35 = vst [vmem:[%s101_s1 + $0x18] sm:$0xf] %v33_v1  ;;  %v42_v4 = vld [vmem:[%s100_s0 + $0x4] ss:$0 sm:$0xff] }
   0x4   :  { %37 = vst [vmem:[%s101_s1 + $0x8] sm:$0xf] %v36_v2  ;;  %38 = vst [vmem:[%s101_s1 + $0x1c] sm:$0xf] %v36_v2 }
   0x5   :  { %40 = vst [vmem:[%s101_s1 + $0xc] sm:$0xf] %v39_v3  ;;  %41 = vst [vmem:[%s101_s1 + $0x20] sm:$0xf] %v39_v3 }
   0x6   :  { %43 = vst [vmem:[%s101_s1 + $0x10] sm:$0xf] %v42_v4  ;;  %44 = vst [vmem:[%s101_s1 + $0x24] sm:$0xf] %v42_v4 }

// kernel: tile.29
= control target key start
LH: loop header
LB: loop body
LE: loop exit
PB: predicated region body
PF: predicated region fallthrough
CT: control target
= control target key end

     0   :  { %s73_s26 = smov 3  ;;  %s57_s27 = smov 3  ;;  %vm54_vm0 = vcmask 64512   ;;  %vm52_vm1 = vcmask 1047556   ;;  %vm70_vm2 = vcmask 261312   ;;  %vm88_vm3 = vcmask 195712   ;;  %s213_s0 = inlined_call_operand.vmem [shape: f32[2,5,4,8], index: 0, kind: input, shape index: {}]   ;;  %s214_s1 = inlined_call_operand.vmem [shape: f32[10,32], index: 1, kind: output, shape index: {}]  }
   0x1   :  { %v124_v0 = vld [vmem:[%s213_s0 + $0x24] sm:$0xf]  ;;  %v125_v1 = vld [vmem:[%s213_s0 + $0x20] sm:$0xf]  ;;  %v126_v2 = vld [vmem:[%s213_s0 + $0x1c] sm:$0xf] }
   0x2   :  { %8 = vst [vmem:[#allocation0 + $0x48] sm:$0xf] %v124_v0  ;;  %13 = vst [vmem:[#allocation0 + $0x40] sm:$0xf] %v125_v1  ;;  %v127_v3 = vld [vmem:[%s213_s0 + $0x18] sm:$0xf] }
   0x3   :  { %18 = vst [vmem:[#allocation0 + $0x38] sm:$0xf] %v126_v2  ;;  %23 = vst [vmem:[#allocation0 + $0x30] sm:$0xf] %v127_v3  ;;  %v128_v4 = vld [vmem:[%s213_s0 + $0x14] sm:$0xf] }
   0x4   :  { %v129_v5 = vld [vmem:[%s213_s0 + $0x10] sm:$0xf]  ;;  %v130_v6 = vld [vmem:[%s213_s0 + $0xc] sm:$0xf]  ;;  %28 = vst [vmem:[#allocation0 + $0x28] sm:$0xf] %v128_v4 }
   0x5   :  { %33 = vst [vmem:[#allocation0 + $0x20] sm:$0xf] %v129_v5  ;;  %38 = vst [vmem:[#allocation0 + $0x18] sm:$0xf] %v130_v6  ;;  %v131_v7 = vld [vmem:[%s213_s0 + $0x8] sm:$0xf] }
   0x6   :  { %v132_v8 = vld [vmem:[%s213_s0 + $0x4] sm:$0xf]  ;;  %v48_v9 = vld [vmem:[%s213_s0] sm:$0xf]  ;;  %43 = vst [vmem:[#allocation0 + $0x10] sm:$0xf] %v131_v7 }
   0x7   :  { %47 = vst [vmem:[#allocation0 + $0x8] sm:$0xf] %v132_v8  ;;  %49 = vst [vmem:[#allocation0] sm:$0xf] %v48_v9  ;;  %s91_s0 = smov 3  ;;  %s140_s28 = smov 16  }
   0x8   :  { %s141_s29 = smov 24   ;;  %s109_s30 = smov 3  ;;  %vm106_vm4 = vcmask 130112  }
   0x9   :  { %v92_v10 = vld [vmem:[#allocation0 + $0x42] ss:$8 sm:%s91_s0]   ;;  %v74_v11 = vld [vmem:[#allocation0 + $0x43] ss:$8 sm:%s73_s26]   ;;  %v58_v12 = vld [vmem:[#allocation0 + $0x40] ss:$8 sm:%s57_s27]  }
   0xa   :  { %93 = vrot.lane.b32.xlu1 %v92_v10, %s140_s28  ;;  %75 = vrot.lane.b32.xlu0 %v74_v11, %s141_s29  ;;  %133 = vst.msk [vmem:[%s214_s1 + $0x8] sm:$0x3] %vm54_vm0, %v58_v12   ;;  %v110_v23 = vld [vmem:[#allocation0 + $0x41] ss:$8 sm:%s109_s30]   ;;  %s142_s6 = smov 8  }
   0xc   :  { %v83_v13 = vld [vmem:[#allocation0 + $0x2] ss:$8 sm:$0xf0]   ;;  %v65_v14 = vld [vmem:[#allocation0 + $0x3] ss:$8 sm:$0xf0]  }
   0xd   :  { %v101_v20 = vld [vmem:[#allocation0 + $0x1] ss:$8 sm:$0xf0]   ;;  %v51_v22 = vld [vmem:[#allocation0] ss:$8 sm:$0xf0]  }
   0xe   :  { %v81_v15 = vld [vmem:[#allocation0 + $0x2] ss:$8 sm:$0xf]   ;;  %v63_v16 = vld [vmem:[#allocation0 + $0x3] ss:$8 sm:$0xf]  }
   0xf   :  { %v85_v17 = vsel %vm52_vm1, %v83_v13, %v81_v15  ;;  %v67_v18 = vsel %vm52_vm1, %v65_v14, %v63_v16  ;;  %v99_v19 = vld [vmem:[#allocation0 + $0x1] ss:$8 sm:$0xf]   ;;  %v50_v21 = vld [vmem:[#allocation0] ss:$8 sm:$0xf]  }
  0x10   :  { %86 = vrot.lane.b32.xlu1 %v85_v17, %s140_s28  ;;  %68 = vrot.lane.b32.xlu0 %v67_v18, %s141_s29  ;;  %v103_v24 = vsel %vm52_vm1, %v101_v20, %v99_v19  ;;  %v53_v25 = vsel %vm52_vm1, %v51_v22, %v50_v21 }
  0x11   :  { %55 = vst.msk [vmem:[%s214_s1] sm:$0xff] %vm54_vm0, %v53_v25  }
  0x14   :  { %111 = vrot.lane.b32.xlu1 %v110_v23, %s142_s6  ;;  %104 = vrot.lane.b32.xlu0 %v103_v24, %s142_s6 }
  0x7c   :  { %v94_v26 = vpop.permute.xlu1 %93   ;;  %v76_v27 = vpop.permute.xlu0 %75  }
  0x7d   :  { %134 = vst.msk [vmem:[%s214_s1 + $0x8] sm:$0x3] %vm70_vm2, %v76_v27  }
  0x7e   :  { %135 = vst.msk [vmem:[%s214_s1 + $0x8] sm:$0x3] %vm88_vm3, %v94_v26  }
  0x82   :  { %v87_v28 = vpop.permute.xlu1 %86   ;;  %v69_v29 = vpop.permute.xlu0 %68  }
  0x83   :  { %71 = vst.msk [vmem:[%s214_s1] sm:$0xff] %vm70_vm2, %v69_v29  }
  0x84   :  { %89 = vst.msk [vmem:[%s214_s1] sm:$0xff] %vm88_vm3, %v87_v28  }
  0x86   :  { %v112_v30 = vpop.permute.xlu1 %111   ;;  %v105_v31 = vpop.permute.xlu0 %104  }
  0x87   :  { %136 = vst.msk [vmem:[%s214_s1 + $0x8] sm:$0x3] %vm106_vm4, %v112_v30   ;;  %107 = vst.msk [vmem:[%s214_s1] sm:$0xff] %vm106_vm4, %v105_v31  }

// kernel: patch_classifier_forward.1
= control target key start
LH: loop header
LB: loop body
LE: loop exit
PB: predicated region body
PF: predicated region fallthrough
CT: control target
= control target key end

     0   :  { %s5287_s0 = inlined_call_operand.vmem [shape: f32[8,512], index: 0, kind: input, shape index: {}]   ;;  %s5288_s1 = inlined_call_operand.vmem [shape: f32[512,32], index: 1, kind: input, shape index: {}]   ;;  %s5289_s2 = inlined_call_operand.vmem [shape: f32[10,8], index: 2, kind: input, shape index: {}]   ;;  %s5290_s3 = inlined_call_operand.vmem [shape: f32[10,32], index: 3, kind: input, shape index: {}]   ;;  %s5291_s4 = inlined_call_operand.vmem [shape: f32[10,32], index: 4, kind: input, shape index: {}]   ;;  %s5292_s5 = inlined_call_operand.vmem [shape: f32[10,32], index: 5, kind: input, shape index: {}]   ;;  %s5293_s6 = inlined_call_operand.vmem [shape: f32[32,32], index: 6, kind: input, shape index: {}]   ;;  %s5294_s7 = inlined_call_operand.vmem [shape: f32[32,32], index: 7, kind: input, shape index: {}]   ;;  %s5295_s8 = inlined_call_operand.vmem [shape: f32[2,10,1], index: 8, kind: input, shape index: {}]   ;;  %s5296_s9 = inlined_call_operand.vmem [shape: f32[2,10,1], index: 9, kind: input, shape index: {}]   ;;  %s5297_s10 = inlined_call_operand.vmem [shape: f32[2,32,96], index: 10, kind: input, shape index: {}]   ;;  %s5298_s11 = inlined_call_operand.vmem [shape: f32[2,1,96], index: 11, kind: input, shape index: {}]   ;;  %s5299_s12 = inlined_call_operand.vmem [shape: f32[2,32,32], index: 12, kind: input, shape index: {}]   ;;  %s5300_s13 = inlined_call_operand.vmem [shape: f32[2,6,32], index: 13, kind: input, shape index: {}]   ;;  %s5301_s14 = inlined_call_operand.vmem [shape: f32[2,32,64], index: 14, kind: input, shape index: {}]   ;;  %s5302_s15 = inlined_call_operand.vmem [shape: f32[2,1,64], index: 15, kind: input, shape index: {}]   ;;  %s5303_s16 = inlined_call_operand.vmem [shape: f32[2,64,32], index: 16, kind: input, shape index: {}]   ;;  %s5304_s17 = inlined_call_operand.vmem [shape: f32[2,32], index: 17, kind: input, shape index: {}]   ;;  %s5305_s18 = inlined_call_operand.vmem [shape: f32[32,4], index: 18, kind: input, shape index: {}]   ;;  %s5306_s19 = inlined_call_operand.vmem [shape: f32[1,4], index: 19, kind: input, shape index: {}]   ;;  %s5307_s20 = inlined_call_operand.vmem [shape: f32[2,10], index: 20, kind: input, shape index: {}]   ;;  %s5308_s21 = inlined_call_operand.hbm [shape: f32[2,4], index: 21, kind: output, shape index: {}]  }
   0x1   :  { %5315 = sst [smem:[#allocation5_spill]] %s5287_s0 }
   0x2   :  { %5316 = sst [smem:[#allocation6_spill]] %s5288_s1 }
   0x3   :  { %5317 = sst [smem:[#allocation7_spill]] %s5289_s2 }
   0x4   :  { %5318 = sst [smem:[#allocation8_spill]] %s5290_s3 }
   0x5   :  { %5319 = sst [smem:[#allocation9_spill]] %s5291_s4 }
   0x6   :  { %5320 = sst [smem:[#allocation10_spill]] %s5292_s5 }
   0x7   :  { %s5321_s26 = sld [smem:[#allocation6_spill]]  ;;  %s5322_s27 = sld [smem:[#allocation5_spill]] }
   0xd   :  { %v101_v0 = vld [vmem:[%s5321_s26 + $0x80] sm:$0xff]  ;;  %v102_v1 = vld [vmem:[%s5321_s26 + $0x88] sm:$0xff]  ;;  %v103_v11 = vld [vmem:[%s5321_s26 + $0x90] sm:$0xff] }
   0xe   :  { %v133_v2 = vld [vmem:[%s5321_s26 + $0x180] sm:$0xff]  ;;  %v3945_v3 = vpack.c.bf16 %v102_v1, %v101_v0  ;;  %v134_v4 = vld [vmem:[%s5321_s26 + $0x188] sm:$0xff]  ;;  %v104_v13 = vld [vmem:[%s5321_s26 + $0x98] sm:$0xff] }
   0xf   :  { %v85_v5 = vld [vmem:[%s5321_s26] sm:$0xff]  ;;  %v86_v6 = vld [vmem:[%s5321_s26 + $0x8] sm:$0xff]  ;;  %v3977_v7 = vpack.c.bf16 %v134_v4, %v133_v2  ;;  %v135_v14 = vld [vmem:[%s5321_s26 + $0x190] sm:$0xff]  ;;  %v3949_v16 = vpack.c.bf16 %v104_v13, %v103_v11 }
  0x10   :  { %v3947_v8 = vpack.c.bf16 %v86_v6, %v85_v5  ;;  %v117_v9 = vld [vmem:[%s5321_s26 + $0x100] sm:$0xff]  ;;  %v118_v10 = vld [vmem:[%s5321_s26 + $0x108] sm:$0xff]  ;;  %3946 = vmatprep.subr.bf16.mxu0 %v3945_v3  ;;  %v136_v15 = vld [vmem:[%s5321_s26 + $0x198] sm:$0xff] }
  0x11   :  { %v3979_v12 = vpack.c.bf16 %v118_v10, %v117_v9  ;;  %3978 = vmatprep.subr.bf16.mxu1 %v3977_v7  ;;  %v3981_v17 = vpack.c.bf16 %v136_v15, %v135_v14  ;;  %v87_v18 = vld [vmem:[%s5321_s26 + $0x10] sm:$0xff]  ;;  %v88_v19 = vld [vmem:[%s5321_s26 + $0x18] sm:$0xff]  ;;  %v105_v23 = vld [vmem:[%s5321_s26 + $0xa0] sm:$0xff] }
  0x12   :  { %3948 = vmatpush3.bf16.msra.mxu0 %v3947_v8  ;;  %v119_v20 = vld [vmem:[%s5321_s26 + $0x110] sm:$0xff]  ;;  %v3951_v21 = vpack.c.bf16 %v88_v19, %v87_v18  ;;  %v120_v22 = vld [vmem:[%s5321_s26 + $0x118] sm:$0xff]  ;;  %v106_v24 = vld [vmem:[%s5321_s26 + $0xa8] sm:$0xff] }
  0x13   :  { %3980 = vmatpush3.bf16.msra.mxu1 %v3979_v12  ;;  %3950 = vmatprep.subr.bf16.mxu0 %v3949_v16  ;;  %v3983_v25 = vpack.c.bf16 %v120_v22, %v119_v20  ;;  %v3953_v26 = vpack.c.bf16 %v106_v24, %v105_v23  ;;  %v137_v27 = vld [vmem:[%s5321_s26 + $0x1a0] sm:$0xff]  ;;  %v138_v28 = vld [vmem:[%s5321_s26 + $0x1a8] sm:$0xff]  ;;  %v107_v35 = vld [vmem:[%s5321_s26 + $0xb0] sm:$0xff] }
  0x14   :  { %3982 = vmatprep.subr.bf16.mxu1 %v3981_v17  ;;  %v89_v29 = vld [vmem:[%s5321_s26 + $0x20] sm:$0xff]  ;;  %v3985_v30 = vpack.c.bf16 %v138_v28, %v137_v27  ;;  %v90_v31 = vld [vmem:[%s5321_s26 + $0x28] sm:$0xff]  ;;  %v108_v36 = vld [vmem:[%s5321_s26 + $0xb8] sm:$0xff] }
  0x15   :  { %v121_v32 = vld [vmem:[%s5321_s26 + $0x120] sm:$0xff]  ;;  %v122_v33 = vld [vmem:[%s5321_s26 + $0x128] sm:$0xff]  ;;  %v3955_v34 = vpack.c.bf16 %v90_v31, %v89_v29  ;;  %v139_v37 = vld [vmem:[%s5321_s26 + $0x1b0] sm:$0xff]  ;;  %v3957_v39 = vpack.c.bf16 %v108_v36, %v107_v35 }
  0x16   :  { %3952 = vmatpush3.bf16.msra.mxu0 %v3951_v21  ;;  %v3987_v38 = vpack.c.bf16 %v122_v33, %v121_v32  ;;  %v140_v40 = vld [vmem:[%s5321_s26 + $0x1b8] sm:$0xff]  ;;  %v91_v41 = vld [vmem:[%s5321_s26 + $0x30] sm:$0xff]  ;;  %v109_v46 = vld [vmem:[%s5321_s26 + $0xc0] sm:$0xff] }
  0x17   :  { %3984 = vmatpush3.bf16.msra.mxu1 %v3983_v25  ;;  %3954 = vmatprep.subr.bf16.mxu0 %v3953_v26  ;;  %v92_v42 = vld [vmem:[%s5321_s26 + $0x38] sm:$0xff]  ;;  %v3989_v43 = vpack.c.bf16 %v140_v40, %v139_v37  ;;  %v123_v44 = vld [vmem:[%s5321_s26 + $0x130] sm:$0xff]  ;;  %v110_v47 = vld [vmem:[%s5321_s26 + $0xc8] sm:$0xff] }
  0x18   :  { %3986 = vmatprep.subr.bf16.mxu1 %v3985_v30  ;;  %v124_v45 = vld [vmem:[%s5321_s26 + $0x138] sm:$0xff]  ;;  %v141_v48 = vld [vmem:[%s5321_s26 + $0x1c0] sm:$0xff]  ;;  %v142_v49 = vld [vmem:[%s5321_s26 + $0x1c8] sm:$0xff]  ;;  %v3959_v50 = vpack.c.bf16 %v92_v42, %v91_v41  ;;  %v3961_v52 = vpack.c.bf16 %v110_v47, %v109_v46 }
  0x19   :  { %v3991_v51 = vpack.c.bf16 %v124_v45, %v123_v44  ;;  %v93_v53 = vld [vmem:[%s5321_s26 + $0x40] sm:$0xff]  ;;  %v94_v54 = vld [vmem:[%s5321_s26 + $0x48] sm:$0xff]  ;;  %v3993_v56 = vpack.c.bf16 %v142_v49, %v141_v48  ;;  %v111_v58 = vld [vmem:[%s5321_s26 + $0xd0] sm:$0xff] }
  0x1a   :  { %3956 = vmatpush3.bf16.msra.mxu0 %v3955_v34  ;;  %v125_v55 = vld [vmem:[%s5321_s26 + $0x140] sm:$0xff]  ;;  %v126_v57 = vld [vmem:[%s5321_s26 + $0x148] sm:$0xff]  ;;  %v112_v59 = vld [vmem:[%s5321_s26 + $0xd8] sm:$0xff]  ;;  %v3963_v62 = vpack.c.bf16 %v94_v54, %v93_v53 }
  0x1b   :  { %3988 = vmatpush3.bf16.msra.mxu1 %v3987_v38  ;;  %3958 = vmatprep.subr.bf16.mxu0 %v3957_v39  ;;  %v143_v60 = vld [vmem:[%s5321_s26 + $0x1d0] sm:$0xff]  ;;  %v144_v61 = vld [vmem:[%s5321_s26 + $0x1d8] sm:$0xff]  ;;  %v3995_v63 = vpack.c.bf16 %v126_v57, %v125_v55  ;;  %v3965_v0 = vpack.c.bf16 %v112_v59, %v111_v58  ;;  %v113_v6 = vld [vmem:[%s5321_s26 + $0xe0] sm:$0xff] }
  0x1c   :  { %3990 = vmatprep.subr.bf16.mxu1 %v3989_v43  ;;  %v95_v1 = vld [vmem:[%s5321_s26 + $0x50] sm:$0xff]  ;;  %v96_v2 = vld [vmem:[%s5321_s26 + $0x58] sm:$0xff]  ;;  %v3997_v4 = vpack.c.bf16 %v144_v61, %v143_v60  ;;  %v114_v7 = vld [vmem:[%s5321_s26 + $0xe8] sm:$0xff] }
  0x1d   :  { %v127_v3 = vld [vmem:[%s5321_s26 + $0x150] sm:$0xff]  ;;  %v128_v5 = vld [vmem:[%s5321_s26 + $0x158] sm:$0xff]  ;;  %v145_v8 = vld [vmem:[%s5321_s26 + $0x1e0] sm:$0xff]  ;;  %v3967_v10 = vpack.c.bf16 %v96_v2, %v95_v1  ;;  %v3969_v15 = vpack.c.bf16 %v114_v7, %v113_v6 }
  0x1e   :  { %3960 = vmatpush3.bf16.msra.mxu0 %v3959_v50  ;;  %v146_v9 = vld [vmem:[%s5321_s26 + $0x1e8] sm:$0xff]  ;;  %v97_v11 = vld [vmem:[%s5321_s26 + $0x60] sm:$0xff]  ;;  %v3999_v14 = vpack.c.bf16 %v128_v5, %v127_v3  ;;  %v84_v18 = vld [vmem:[%s5322_s27 + $0x18] sm:$0xff] }
  0x1f   :  { %3992 = vmatpush3.bf16.msra.mxu1 %v3991_v51  ;;  %3962 = vmatprep.subr.bf16.mxu0 %v3961_v52  ;;  %v98_v12 = vld [vmem:[%s5321_s26 + $0x68] sm:$0xff]  ;;  %v129_v13 = vld [vmem:[%s5321_s26 + $0x160] sm:$0xff]  ;;  %v4001_v19 = vpack.c.bf16 %v146_v9, %v145_v8  ;;  %v115_v20 = vld [vmem:[%s5321_s26 + $0xf0] sm:$0xff] }
  0x20   :  { %3994 = vmatprep.subr.bf16.mxu1 %v3993_v56  ;;  %v130_v16 = vld [vmem:[%s5321_s26 + $0x168] sm:$0xff]  ;;  %v116_v21 = vld [vmem:[%s5321_s26 + $0xf8] sm:$0xff] }
  0x21   :  { %v82_v17 = vld [vmem:[%s5322_s27 + $0x8] sm:$0xff] }
  0x22   :  { %3964 = vmatpush3.bf16.msra.mxu0 %v3963_v62  ;;  %213 = vmatprep.mubr.f32.mxu0 %v82_v17 }
  0x23   :  { %3996 = vmatpush3.bf16.msra.mxu1 %v3995_v63  ;;  %3966 = vmatprep.subr.bf16.mxu0 %v3965_v0 }
  0x24   :  { %3998 = vmatprep.subr.bf16.mxu1 %v3997_v4 }
  0x25   :  { %26 = vsyncpa [#allocation3], 0  ;;  %v147_v22 = vld [vmem:[%s5321_s26 + $0x1f0] sm:$0xff]  ;;  %v148_v23 = vld [vmem:[%s5321_s26 + $0x1f8] sm:$0xff]  ;;  %283 = vmatprep.mubr.f32.mxu1 %v84_v18  ;;  %v3971_v24 = vpack.c.bf16 %v98_v12, %v97_v11  ;;  %v4003_v25 = vpack.c.bf16 %v130_v16, %v129_v13  ;;  %v3973_v26 = vpack.c.bf16 %v116_v21, %v115_v20  ;;  %s5323_s24 = sld [smem:[#allocation7_spill]]  ;;  %vm293_vm0 = vcmask 64512  }
  0x26   :  { %3968 = vmatpush3.bf16.msra.mxu0 %v3967_v10  ;;  %v99_v27 = vld [vmem:[%s5321_s26 + $0x70] sm:$0xff]  ;;  %v100_v28 = vld [vmem:[%s5321_s26 + $0x78] sm:$0xff]  ;;  %v4005_v29 = vpack.c.bf16 %v148_v23, %v147_v22  ;;  %v81_v34 = vld [vmem:[%s5322_s27] sm:$0xff]  ;;  %s5324_s1 = sld [smem:[#allocation9_spill]]  ;;  %s4325_s2 = smov 32   ;;  %vm387_vm1 = vcmask 261120  }
  0x27   :  { %4000 = vmatpush3.bf16.msra.mxu1 %v3999_v14  ;;  %3970 = vmatprep.subr.bf16.mxu0 %v3969_v15  ;;  %v131_v30 = vld [vmem:[%s5321_s26 + $0x170] sm:$0xff]  ;;  %v132_v31 = vld [vmem:[%s5321_s26 + $0x178] sm:$0xff]  ;;  %v3975_v32 = vpack.c.bf16 %v100_v28, %v99_v27  ;;  %v376_v37 = vld [vmem:[%s5297_s10] sm:$0xff]  ;;  %s5325_s4 = sld [smem:[#allocation8_spill]]  ;;  %v4327_v9 = vmov 0   ;;  %vm847_vm4 = vcmask 517376  }
  0x28   :  { %4002 = vmatprep.subr.bf16.mxu1 %v4001_v19  ;;  %v4007_v33 = vpack.c.bf16 %v132_v31, %v131_v30  ;;  %v83_v35 = vld [vmem:[%s5322_s27 + $0x10] sm:$0xff]  ;;  %v377_v38 = vld [vmem:[%s5297_s10 + $0x8] sm:$0xff]  ;;  %v379_v49 = vld [vmem:[%s5297_s10 + $0x18] sm:$0xff]  ;;  %4229 = vset.pattern.permute.xlu1 %v4327_v9  ;;  %s5326_s27 = sld [smem:[#allocation10_spill]]  ;;  %vm845_vm5 = vcmask 523520   ;;  %s4328_s23 = smov 64  }
  0x29   :  { %v4009_v39 = vpack.c.bf16 %v377_v38, %v376_v37  ;;  %v378_v48 = vld [vmem:[%s5297_s10 + $0x10] sm:$0xff]  ;;  %v73_v52 = vld [vmem:[%s5293_s6] sm:$0xff]  ;;  %v74_v53 = vld [vmem:[%s5293_s6 + $0x8] sm:$0xff]  ;;  %4228 = vset.pattern.permute.xlu0 %v4327_v9  ;;  %vm753_vm6 = vcmask 1041408   ;;  %vm4329_vm7 = vmmov 1   ;;  %vm740_vm9 = vcmask 80896  }
  0x2a   :  { %3972 = vmatpush3.bf16.msra.mxu0 %v3971_v24  ;;  %v4013_v50 = vpack.c.bf16 %v379_v49, %v378_v48  ;;  %v4686_v55 = vpack.c.bf16 %v74_v53, %v73_v52  ;;  %v75_v62 = vld [vmem:[%s5293_s6 + $0x10] sm:$0xff]  ;;  %v76_v63 = vld [vmem:[%s5293_s6 + $0x18] sm:$0xff]  ;;  %v3318_v1 = vld [vmem:[%s5298_s11] ss:$0 sm:$0xff]  ;;  %s4326_s6 = smov 96   ;;  %vm1486_vm12 = vcmask 254976  }
  0x2b   :  { %4004 = vmatpush3.bf16.msra.mxu1 %v4003_v25  ;;  %3974 = vmatprep.subr.bf16.mxu0 %v3973_v26  ;;  %v289_v36 = vld [vmem:[%s5323_s24] sm:$0xff]  ;;  %v290_v47 = vld [vmem:[%s5323_s24 + $0x8] sm:$0x3]  ;;  %v4714_v0 = vpack.c.bf16 %v76_v63, %v75_v62  ;;  %v3334_v49 = vld [vmem:[%s5295_s8 + $0x10] sm:$0xff]  ;;  %vm1645_vm13 = vcmask 523264  }
  0x2c   :  { %4006 = vmatprep.subr.bf16.mxu1 %v4005_v29  ;;  %v4671_v51 = vld [vmem:[%s5324_s1] sm:$0xff]  ;;  %v4684_v54 = vld [vmem:[%s5324_s1 + $0x8] sm:$0x3]  ;;  %vm4794_vm8 = vmpackc.low %vm753_vm6, %vm4329_vm7 }
  0x2d   :  { %558 = vrot.lane.b32.xlu1 %v4671_v51, %s4325_s2  ;;  %v291_v56 = vld [vmem:[%s5325_s4] sm:$0xff]  ;;  %v292_v57 = vld [vmem:[%s5325_s4 + $0x8] sm:$0x3] }
  0x2e   :  { %3976 = vmatpush3.bf16.msra.mxu0 %v3975_v32  ;;  %v4742_v10 = vld [vmem:[%s5326_s27 + $0x8] sm:$0x3]  ;;  %v4747_v11 = vld [vmem:[%s5326_s27] sm:$0xff] }
  0x2f   :  { %4008 = vmatpush3.bf16.msra.mxu1 %v4007_v33  ;;  %v682_v24 = vld [vmem:[%s5295_s8 + $0x8] sm:$0x3]  ;;  %v681_v25 = vld [vmem:[%s5295_s8] sm:$0xff] }
  0x30   :  { %4010 = vmatprep.subr.bf16.mxu1 %v4009_v39  ;;  %v4809_v63 = vld [vmem:[%s5294_s7] sm:$0xff] }
  0x31   :  { %214 = vmatmul.mubr.f32.vlgmr.msra.gmra.mrb[0].mxu0 %v81_v34  ;;  %560 = vrot.lane.b32.xlu1 %v4684_v54, %s4325_s2 }
  0x32   :  { %284 = vmatmul.mubr.f32.vlgmr.msra.gmra.mrb[0].mxu1 %v83_v35  ;;  %3648 = vmatprep.mubr.msk.f32.mxu0 %vm293_vm0, %v289_v36 }
  0x33   :  { %4012 = vmatpush3.bf16.msra.mxu1 %v4009_v39 }
  0x34   :  { %4014 = vmatprep.subr.bf16.mxu1 %v4013_v50 }
  0x37   :  { %4016 = vmatpush3.bf16.msra.mxu1 %v4013_v50  ;;  %v3335_v50 = vld [vmem:[%s5295_s8 + $0x18] sm:$0x3] }
  0x38   :  { %4026 = vmatprep.subr.bf16.mxu1 %v4686_v55 }
  0x9f   :  { %v4769_v26 = vpop.permute.xlu1 %558 }
  0xa3   :  { %v4771_v27 = vpop.permute.xlu1 %560 }
 0x104   :  { %v3445_v40 = vpop.f32.mrb[0].mxu0 }
 0x105   :  { %v3480_v41 = vpop.f32.mrb[0].mxu1  ;;  %v3446_v42 = vpop.f32.mrb[1].mxu0 }
 0x106   :  { %v3447_v43 = vadd.f32 %v3446_v42, %v3445_v40  ;;  %v3481_v44 = vpop.f32.mrb[1].mxu1 }
 0x107   :  { %v3482_v45 = vadd.f32 %v3481_v44, %v3480_v41 }
 0x109   :  { %v286_v46 = vadd.f32 %v3482_v45, %v3447_v43 }
 0x10b   :  { %3646 = vmatprep.subr.mxu0 %v286_v46 }
 0x10c   :  { %3647 = vmatpush3.msra.mxu0 %v286_v46 }
 0x10d   :  { %3649 = vmatmul.mubr.msk.f32.vlgmr.msra.gmra.mrb[2].mxu0 %vm293_vm0, %v290_v47  ;;  %4018 = vmatprep.subr.bf16.mxu0 %v4686_v55 }
 0x10e   :  { %4020 = vmatpush3.bf16.msra.mxu0 %v4686_v55 }
 0x10f   :  { %4022 = vmatprep.subr.bf16.mxu0 %v4714_v0 }
 0x112   :  { %4024 = vmatpush3.bf16.msra.mxu0 %v4714_v0 }
 0x1e0   :  { %v3650_v58 = vpop.f32.mrb[2].mxu0 }
 0x1e1   :  { %v366_v59 = vpop.f32.mrb[3].mxu0  ;;  %v4701_v61 = vadd.f32 %v3650_v58, %v292_v57 }
 0x1e2   :  { %v4699_v60 = vadd.f32 %v366_v59, %v291_v56 }
 0x1e4   :  { %3659 = vmatprep.mubr.msk.f32.mxu1 %vm387_vm1, %v4699_v60 }
 0x1e5   :  { %3660 = vmatmul.mubr.msk.f32.vlgmr.msra.gmra.mrb[2].mxu1 %vm387_vm1, %v4701_v61 }
 0x1e6   :  { %4028 = vmatpush3.bf16.msra.mxu1 %v4686_v55 }
 0x1e7   :  { %4030 = vmatprep.subr.bf16.mxu1 %v4714_v0 }
 0x1ea   :  { %4032 = vmatpush3.bf16.msra.mxu1 %v4714_v0 }
 0x2b8   :  { %v3661_v2 = vpop.f32.mrb[2].mxu1 }
 0x2b9   :  { %v4723_v3 = vadd.f32 %v3661_v2, %v3318_v1  ;;  %v460_v4 = vpop.f32.mrb[3].mxu1  ;;  %v4819_v2 = vld [vmem:[%s5294_s7 + $0x10] sm:$0xff] }
 0x2ba   :  { %v4725_v5 = vadd.f32 %v3318_v1, %v460_v4  ;;  %v4814_v1 = vld [vmem:[%s5294_s7 + $0x8] sm:$0xff]  ;;  %v4828_v4 = vld [vmem:[%s5294_s7 + $0x18] sm:$0xff] }
 0x2bb   :  { %v470_v13 = vmul.f32 %v4723_v3, %v4684_v54  ;;  %v565_v28 = vmul.f32 %v4771_v27, %v4723_v3 }
 0x2bc   :  { %566 = vrot.lane.b32.xlu0 %v4725_v5, %s4326_s6  ;;  %3670 = vmatprep.mubr.msk.f32.mxu0 %vm387_vm1, %v4725_v5  ;;  %v4230_v6 = vpack.i.bf16 %v4723_v3, %v4725_v5  ;;  %v469_v16 = vmul.f32 %v4725_v5, %v4671_v51  ;;  %v564_v30 = vmul.f32 %v4769_v26, %v4725_v5 }
 0x2bd   :  { %3671 = vmatmul.mubr.msk.f32.vlgmr.msra.gmra.mrb[4].mxu0 %vm387_vm1, %v4723_v3  ;;  %v4832_v5 = vpack.c.bf16 %v4828_v4, %v4819_v2 }
 0x2c0   :  { %568 = vrot.lane.b32.xlu0 %v4723_v3, %s4326_s6  ;;  %v4823_v3 = vpack.c.bf16 %v4814_v1, %v4809_v63 }
 0x2c2   :  { %4048 = vmatprep.subr.bf16.mxu1 %v4823_v3 }
 0x32e   :  { %v567_v7 = vpop.permute.xlu0 %566 }
 0x32f   :  { %3681 = vmatprep.mubr.msk.f32.mxu1 %vm387_vm1, %v567_v7 }
 0x332   :  { %v569_v8 = vpop.permute.xlu0 %568 }
 0x333   :  { %3682 = vmatmul.mubr.msk.f32.vlgmr.msra.gmra.mrb[4].mxu1 %vm387_vm1, %v569_v8 }
 0x334   :  { %4050 = vmatpush3.bf16.msra.mxu1 %v4823_v3 }
 0x335   :  { %4052 = vmatprep.subr.bf16.mxu1 %v4832_v5 }
 0x338   :  { %4054 = vmatpush3.bf16.msra.mxu1 %v4832_v5 }
 0x390   :  { %v3672_v12 = vpop.f32.mrb[4].mxu0 }
 0x391   :  { %v553_v14 = vmul.f32 %v3672_v12, %v4742_v10  ;;  %v543_v15 = vpop.f32.mrb[5].mxu0 }
 0x392   :  { %v552_v17 = vmul.f32 %v543_v15, %v4747_v11 }
 0x393   :  { %v4755_v18 = vadd.f32 %v553_v14, %v470_v13 }
 0x394   :  { %v4757_v19 = vadd.f32 %v552_v17, %v469_v16 }
 0x395   :  { %vm662_vm11 = vcmp.gt.f32.partialorder %v4755_v18, 0.0 }
 0x396   :  { %vm661_vm10 = vcmp.gt.f32.partialorder %v4757_v19, 0.0 }
 0x406   :  { %v3683_v20 = vpop.f32.mrb[4].mxu1 }
 0x407   :  { %v650_v21 = vmul.f32 %v3683_v20, %v4742_v10  ;;  %v640_v22 = vpop.f32.mrb[5].mxu1 }
 0x408   :  { %v649_v23 = vmul.f32 %v640_v22, %v4747_v11 }
 0x409   :  { %655 = vrot.lane.b32.xlu1 %v650_v21, %s4325_s2 }
 0x40a   :  { %653 = vrot.lane.b32.xlu0 %v649_v23, %s4325_s2  ;;  %v1024_v23 = vld [vmem:[%s5296_s9] sm:$0xff] }
 0x40d   :  { %690 = vperm.xlu1 %4229, %v682_v24   ;;  %v3345_v24 = vld [vmem:[%s5296_s9 + $0x10] sm:$0xff] }
 0x40e   :  { %685 = vperm.xlu0 %4228, %v681_v25   ;;  %v1025_v25 = vld [vmem:[%s5296_s9 + $0x8] sm:$0x3] }
 0x47b   :  { %v656_v29 = vpop.permute.xlu1 %655 }
 0x47c   :  { %v660_v31 = vadd.f32 %v656_v29, %v565_v28  ;;  %v654_v32 = vpop.permute.xlu0 %653  ;;  %v3346_v28 = vld [vmem:[%s5296_s9 + $0x18] sm:$0x3]  ;;  %v665_v29 = vmul.f32 1.442695, %v4757_v19 }
 0x47d   :  { %v659_v33 = vadd.f32 %v654_v32, %v564_v30 }
 0x47e   :  { %v677_v34 = vmul.f32 1.442695, %v660_v31  ;;  %v674_v36 = vadd.f32 1.0, %v660_v31  ;;  %vm672_vm2 = vcmp.gt.f32.partialorder %v660_v31, 0.0 }
 0x47f   :  { %v675_v35 = vmul.f32 1.442695, %v659_v33  ;;  %v673_v38 = vadd.f32 1.0, %v659_v33  ;;  %vm671_vm3 = vcmp.gt.f32.partialorder %v659_v33, 0.0 }
 0x480   :  { %4240 = vpow2.f32 %v677_v34 }
 0x481   :  { %4242 = vpow2.f32 %v675_v35  ;;  %v663_v35 = vadd.f32 1.0, %v4757_v19 }
 0x482   :  { %4244 = vpow2.f32 %v665_v29 }
 0x48a   :  { %v4241_v37 = vpop.eup %4240 }
 0x48b   :  { %v4243_v39 = vpop.eup %4242  ;;  %v680_v40 = vsel %vm672_vm2, %v674_v36, %v4241_v37 }
 0x48c   :  { %v4777_v41 = vpop.permute.xlu1 %690  ;;  %v679_v42 = vsel %vm671_vm3, %v673_v38, %v4243_v39  ;;  %v4245_v34 = vpop.eup %4244  ;;  %v667_v39 = vmul.f32 1.442695, %v4755_v18  ;;  %vm4331_vm3 = vmmov 0  }
 0x48d   :  { %v694_v43 = vmul.f32 %v4777_v41, %v680_v40  ;;  %v4780_v44 = vpop.permute.xlu0 %685  ;;  %v669_v38 = vsel %vm661_vm10, %v663_v35, %v4245_v34 }
 0x48e   :  { %v693_v45 = vmul.f32 %v4780_v44, %v679_v42  ;;  %4246 = vpow2.f32 %v667_v39 }
 0x48f   :  { %v848_v46 = vsel %vm847_vm4, %v694_v43, 0.0  ;;  %699 = vrot.lane.b32.xlu0 %v694_v43, %s4326_s6 }
 0x490   :  { %v846_v47 = vsel %vm845_vm5, %v693_v45, 0.0  ;;  %697 = vrot.lane.b32.xlu1 %v693_v45, %s4326_s6  ;;  %v664_v45 = vadd.f32 1.0, %v4755_v18 }
 0x491   :  { %v849_v48 = vadd.f32 %v848_v46, %v846_v47 }
 0x493   :  { %v850_v15 = vrot.slane %v849_v48, 4 }
 0x494   :  { %4231 = vrot.lane.b32.xlu1 %v4230_v6, %s4328_s23 }
 0x495   :  { %v851_v16 = vadd.f32 %v850_v15, %v849_v48 }
 0x497   :  { %v852_v17 = vrot.slane %v851_v16, 2 }
 0x498   :  { %1049 = vperm.xlu1 %4229, %v3334_v49   ;;  %v4247_v43 = vpop.eup %4246 }
 0x499   :  { %v853_v20 = vadd.f32 %v852_v17, %v851_v16  ;;  %v4872_v47 = vsel %vm662_vm11, %v664_v45, %v4247_v43 }
 0x49b   :  { %v854_v21 = vrot.slane %v853_v20, 1 }
 0x49c   :  { %1054 = vperm.xlu1 %4229, %v3335_v50  }
 0x49d   :  { %v855_v22 = vadd.f32 %v854_v21, %v853_v20 }
 0x501   :  { %v700_v53 = vpop.permute.xlu0 %699 }
 0x502   :  { %v698_v52 = vpop.permute.xlu1 %697 }
 0x503   :  { %703 = vxpose.xlu0.b32.start [1/2] (short) (narrow) %v698_v52, 32 }
 0x506   :  { %v4232_v56 = vpop.permute.xlu1 %4231 }
 0x507   :  { %v4234_v57 = vunpack.i.h.bf16 %v4232_v56  ;;  %v4233_v58 = vunpack.i.l.bf16 %v4232_v56  ;;  %704 = vxpose.xlu0.b32.end [2/2] (short) (narrow) %v700_v53, 32 }
 0x509   :  { %v4798_v62 = vpack.c.bf16 %v4234_v57, %v4233_v58 }
 0x50b   :  { %4035 = vmatprep.subr.msk.bf16.mxu0 %vm4794_vm8, %v4798_v62 }
 0x50c   :  { %4038 = vmatpush3.bf16.msk.msra.mxu0 %vm4794_vm8, %v4798_v62 }
 0x517   :  { %v4837_v6 = vpop.permute.xlu1 %1049 }
 0x518   :  { %v1057_v7 = vmul.f32 %v4837_v6, %v679_v42 }
 0x51a   :  { %1061 = vrot.lane.b32.xlu1 %v1057_v7, %s4326_s6  ;;  %v1200_v12 = vsel %vm845_vm5, %v1057_v7, 0.0 }
 0x51b   :  { %v4842_v8 = vpop.permute.xlu1 %1054 }
 0x51c   :  { %v1058_v9 = vmul.f32 %v4842_v8, %v680_v40 }
 0x51e   :  { %v1201_v13 = vsel %vm847_vm4, %v1058_v9, 0.0  ;;  %1063 = vrot.lane.b32.xlu1 %v1058_v9, %s4326_s6 }
 0x51f   :  { %v1202_v14 = vadd.f32 %v1201_v13, %v1200_v12 }
 0x521   :  { %v1203_v40 = vrot.slane %v1202_v14, 4 }
 0x523   :  { %v1204_v42 = vadd.f32 %v1203_v40, %v1202_v14 }
 0x525   :  { %v1205_v46 = vrot.slane %v1204_v42, 2 }
 0x527   :  { %v1206_v50 = vadd.f32 %v1205_v46, %v1204_v42 }
 0x529   :  { %v1207_v52 = vrot.slane %v1206_v50, 1 }
 0x52b   :  { %v1208_v53 = vadd.f32 %v1207_v52, %v1206_v50  ;;  %v1392_v50 = vld [vmem:[%s5299_s12] sm:$0xff]  ;;  %v1393_v52 = vld [vmem:[%s5299_s12 + $0x8] sm:$0xff] }
 0x538   :  { %938 = vrot.lane.b32.xlu0 %v855_v22, %s4326_s6 }
 0x53c   :  { %1032 = vperm.xlu0 %4228, %v1024_v23  }
 0x540   :  { %1380 = vperm.xlu0 %4228, %v3345_v24  }
 0x544   :  { %1037 = vperm.xlu0 %4228, %v1025_v25  }
 0x548   :  { %1385 = vperm.xlu0 %4228, %v3346_v28  }
 0x583   :  { %v719_v30 = vpop.trf.xlu0 }
 0x584   :  { %3688 = vmatprep.mubr.msk.f32.mxu0 %vm740_vm9, %v719_v30 }
 0x587   :  { %v720_v31 = vpop.trf.xlu0 }
 0x588   :  { %3689 = vmatmul.mubr.msk.f32.vlgmr.msra.gmra.mrb[6].mxu0 %vm740_vm9, %v720_v31 }
 0x58b   :  { %v721_v32 = vpop.trf.xlu0 }
 0x58c   :  { %v1062_v33 = vpop.permute.xlu1 %1061  ;;  %3691 = vmatprep.mubr.msk.f32.mxu0 %vm740_vm9, %v721_v32 }
 0x58d   :  { %1067 = vxpose.xlu1.b32.start [1/2] (short) (narrow) %v1062_v33, 32 }
 0x58f   :  { %v722_v36 = vpop.trf.xlu0 }
 0x590   :  { %v1064_v37 = vpop.permute.xlu1 %1063  ;;  %3692 = vmatmul.mubr.msk.f32.gmra.mrb[8].mxu0 %vm740_vm9, %v722_v36 }
 0x591   :  { %1068 = vxpose.xlu1.b32.end [2/2] (short) (narrow) %v1064_v37, 32  ;;  %3702 = vmatprep.mubr.msk.f32.mxu0 %vm387_vm1, %v669_v38 }
 0x5aa   :  { %v939_v19 = vpop.permute.xlu0 %938 }
 0x5ab   :  { %v941_v48 = vmul.f32 %v939_v19, %v669_v38  ;;  %v942_v49 = vmul.f32 %v939_v19, %v4872_v47 }
 0x5ad   :  { %3713 = vmatprep.mubr.msk.f32.mxu1 %vm387_vm1, %v941_v48 }
 0x5ae   :  { %3714 = vmatmul.mubr.msk.f32.vlgmr.msra.gmra.mrb[6].mxu1 %vm387_vm1, %v942_v49 }
 0x5af   :  { %3734 = vmatprep.mubr.msk.f32.mxu1 %vm387_vm1, %v669_v38 }
 0x5b7   :  { %1285 = vrot.lane.b32.xlu1 %v1208_v53, %s4326_s6  ;;  %v4077_v53 = vpack.c.bf16 %v1393_v52, %v1392_v50 }
 0x60d   :  { %v1083_v56 = vpop.trf.xlu1 }
 0x611   :  { %v1084_v9 = vpop.trf.xlu1 }
 0x615   :  { %v1085_v16 = vpop.trf.xlu1 }
 0x619   :  { %v1086_v21 = vpop.trf.xlu1 }
 0x629   :  { %v1286_v22 = vpop.permute.xlu1 %1285 }
 0x62a   :  { %v1288_v23 = vmul.f32 %v1286_v22, %v669_v38 }
 0x65b   :  { %v3690_v18 = vpop.f32.mrb[6].mxu0 }
 0x65c   :  { %v842_v57 = vmul.f32 %v3690_v18, %v4814_v1  ;;  %v822_v58 = vpop.f32.mrb[7].mxu0  ;;  %v1395_v18 = vld [vmem:[%s5299_s12 + $0x18] sm:$0xff] }
 0x65d   :  { %v841_v7 = vmul.f32 %v822_v58, %v4809_v63 }
 0x65f   :  { %v4039_v12 = vpack.c.bf16 %v842_v57, %v841_v7  ;;  %v4920_v57 = vpop.permute.xlu0 %1032 }
 0x661   :  { %4040 = vmatprep.subr.bf16.mxu0 %v4039_v12 }
 0x662   :  { %4042 = vmatpush3.bf16.msra.mxu0 %v4039_v12 }
 0x663   :  { %v3693_v13 = vpop.f32.mrb[8].mxu0 }
 0x664   :  { %v844_v14 = vmul.f32 %v3693_v13, %v4828_v4  ;;  %v832_v15 = vpop.f32.mrb[9].mxu0 }
 0x665   :  { %v843_v17 = vmul.f32 %v832_v15, %v4819_v2 }
 0x667   :  { %v4043_v20 = vpack.c.bf16 %v844_v14, %v843_v17 }
 0x669   :  { %4044 = vmatprep.subr.bf16.mxu0 %v4043_v20 }
 0x66a   :  { %4046 = vmatpush3.bf16.msra.mxu0 %v4043_v20 }
 0x66b   :  { %4057 = vmatprep.subr.msk.bf16.mxu0 %vm4794_vm8, %v4798_v62 }
 0x66d   :  { %3703 = vmatmul.mubr.msk.f32.vlgmr.msra.gmra.mrb[10].mxu0 %vm387_vm1, %v4872_v47 }
 0x66e   :  { %4060 = vmatpush3.bf16.msk.msra.mxu0 %vm4794_vm8, %v4798_v62  ;;  %3720 = vmatprep.mubr.msk.f32.mxu0 %vm740_vm9, %v1083_v56  ;;  %v1289_v62 = vmul.f32 %v1286_v22, %v4872_v47  ;;  %v1394_v56 = vld [vmem:[%s5299_s12 + $0x10] sm:$0xff] }
 0x66f   :  { %4070 = vmatprep.subr.bf16.mxu0 %v4823_v3 }
 0x671   :  { %3721 = vmatmul.mubr.msk.f32.vlgmr.msra.gmra.mrb[12].mxu0 %vm740_vm9, %v1084_v9  ;;  %v4922_v9 = vpop.permute.xlu0 %1380 }
 0x672   :  { %4072 = vmatpush3.bf16.msra.mxu0 %v4823_v3  ;;  %3723 = vmatprep.mubr.msk.f32.mxu0 %vm740_vm9, %v1085_v16 }
 0x673   :  { %4074 = vmatprep.subr.bf16.mxu0 %v4832_v5 }
 0x675   :  { %3724 = vmatmul.mubr.msk.f32.gmra.mrb[14].mxu0 %vm740_vm9, %v1086_v21  ;;  %v4924_v12 = vpop.permute.xlu0 %1037 }
 0x676   :  { %4076 = vmatpush3.bf16.msra.mxu0 %v4832_v5  ;;  %3745 = vmatprep.mubr.msk.f32.mxu0 %vm387_vm1, %v1288_v23 }
 0x679   :  { %3746 = vmatmul.mubr.msk.f32.vlgmr.msra.gmra.mrb[16].mxu0 %vm387_vm1, %v1289_v62  ;;  %v4926_v20 = vpop.permute.xlu0 %1385 }
 0x681   :  { %v3715_v24 = vpop.f32.mrb[6].mxu1 }
 0x682   :  { %v1015_v25 = vpop.f32.mrb[7].mxu1  ;;  %v1021_v28 = vadd.f32 1e-06, %v3715_v24 }
 0x683   :  { %v1016_v29 = vadd.f32 1e-06, %v1015_v25 }
 0x684   :  { %4248 = vrcp.f32 %v1021_v28 }
 0x685   :  { %4250 = vrcp.f32 %v1016_v29  ;;  %v1396_v29 = vlaneseq }
 0x68e   :  { %v4249_v30 = vpop.eup %4248 }
 0x68f   :  { %v4251_v32 = vpop.eup %4250 }
 0x740   :  { %v3704_v31 = vpop.f32.mrb[10].mxu0 }
 0x741   :  { %v1029_v33 = vmul.f32 %v4249_v30, %v3704_v31  ;;  %v928_v34 = vpop.f32.mrb[11].mxu0  ;;  %v4934_v30 = vshrl.u32 %v1396_v29, 7 }
 0x742   :  { %v1027_v35 = vmul.f32 %v4251_v32, %v928_v34  ;;  %v4942_v32 = vld [vmem:[%s5300_s13] sm:$0x3f] }
 0x743   :  { %v1041_v22 = vmul.f32 %v4924_v12, %v1029_v33  ;;  %v4937_v31 = vsub.s32 0, %v4934_v30 }
 0x744   :  { %v3722_v36 = vpop.f32.mrb[12].mxu0  ;;  %v1040_v62 = vmul.f32 %v4920_v57, %v1027_v35 }
 0x745   :  { %v1197_v37 = vmul.f32 %v3722_v36, %v4814_v1  ;;  %v1177_v38 = vpop.f32.mrb[13].mxu0  ;;  %v1399_v33 = vrot.slane %v4942_v32, %v4937_v31 }
 0x746   :  { %v1196_v39 = vmul.f32 %v1177_v38, %v4809_v63 }
 0x748   :  { %v4061_v40 = vpack.c.bf16 %v1197_v37, %v1196_v39  ;;  %v3725_v42 = vpop.f32.mrb[14].mxu0 }
 0x749   :  { %v1199_v43 = vmul.f32 %v3725_v42, %v4828_v4  ;;  %v1187_v45 = vpop.f32.mrb[15].mxu0 }
 0x74a   :  { %v1198_v46 = vmul.f32 %v1187_v45, %v4819_v2  ;;  %4062 = vmatprep.subr.bf16.mxu1 %v4061_v40 }
 0x74b   :  { %4064 = vmatpush3.bf16.msra.mxu1 %v4061_v40 }
 0x74c   :  { %v4065_v19 = vpack.c.bf16 %v1199_v43, %v1198_v46  ;;  %v3747_v48 = vpop.f32.mrb[16].mxu0 }
 0x74d   :  { %v1362_v49 = vpop.f32.mrb[17].mxu0  ;;  %v1368_v58 = vadd.f32 1e-06, %v3747_v48 }
 0x74e   :  { %4066 = vmatprep.subr.bf16.mxu1 %v4065_v19  ;;  %v1363_v7 = vadd.f32 1e-06, %v1362_v49 }
 0x74f   :  { %4068 = vmatpush3.bf16.msra.mxu1 %v4065_v19  ;;  %4252 = vrcp.f32 %v1368_v58  ;;  %v1526_v58 = vld [vmem:[%s5301_s14 + $0x18] sm:$0xff] }
 0x750   :  { %4078 = vmatprep.subr.bf16.mxu1 %v4077_v53  ;;  %4254 = vrcp.f32 %v1363_v7 }
 0x752   :  { %3735 = vmatmul.mubr.msk.f32.vlgmr.msra.gmra.mrb[8].mxu1 %vm387_vm1, %v4872_v47  ;;  %v4081_v47 = vpack.c.bf16 %v1395_v18, %v1394_v56  ;;  %v1524_v56 = vld [vmem:[%s5301_s14 + $0x8] sm:$0xff] }
 0x753   :  { %4080 = vmatpush3.bf16.msra.mxu1 %v4077_v53 }
 0x754   :  { %4082 = vmatprep.subr.bf16.mxu1 %v4081_v47 }
 0x757   :  { %4084 = vmatpush3.bf16.msra.mxu1 %v4081_v47  ;;  %v1525_v47 = vld [vmem:[%s5301_s14 + $0x10] sm:$0xff] }
 0x758   :  { %v4089_v7 = vpack.c.bf16 %v1526_v58, %v1525_v47 }
 0x759   :  { %v4253_v13 = vpop.eup %4252 }
 0x75a   :  { %v4255_v15 = vpop.eup %4254 }
 0x825   :  { %v3736_v14 = vpop.f32.mrb[8].mxu1 }
 0x826   :  { %v1377_v16 = vmul.f32 %v4253_v13, %v3736_v14  ;;  %v1275_v17 = vpop.f32.mrb[9].mxu1 }
 0x827   :  { %v1375_v21 = vmul.f32 %v4255_v15, %v1275_v17 }
 0x828   :  { %v1389_v23 = vmul.f32 %v4926_v20, %v1377_v16 }
 0x829   :  { %v1388_v24 = vmul.f32 %v4922_v9, %v1375_v21 }
 0x82a   :  { %v1391_v25 = vadd.f32 %v1389_v23, %v1041_v22  ;;  %v4965_v22 = vsub.s32 1, %v4934_v30  ;;  %v1519_v23 = vsub.s32 2, %v4934_v30 }
 0x82b   :  { %v1390_v28 = vadd.f32 %v1388_v24, %v1040_v62 }
 0x82c   :  { %v1514_v62 = vrot.slane %v4942_v32, %v4965_v22 }
 0x82d   :  { %3756 = vmatprep.mubr.msk.f32.mxu1 %vm387_vm1, %v1390_v28  ;;  %v1520_v28 = vrot.slane %v4942_v32, %v1519_v23 }
 0x82e   :  { %3757 = vmatmul.mubr.msk.f32.vlgmr.msra.gmra.mrb[10].mxu1 %vm387_vm1, %v1391_v25 }
 0x901   :  { %v3758_v34 = vpop.f32.mrb[10].mxu1 }
 0x902   :  { %v1478_v35 = vadd.f32 %v3758_v34, %v1399_v33  ;;  %v1472_v36 = vpop.f32.mrb[11].mxu1 }
 0x903   :  { %v1473_v37 = vadd.f32 %v1472_v36, %v1399_v33 }
 0x904   :  { %v1482_v38 = vadd.f32 %v1478_v35, %v4701_v61 }
 0x905   :  { %v1481_v39 = vadd.f32 %v1473_v37, %v4699_v60  ;;  %v1523_v60 = vld [vmem:[%s5301_s14] sm:$0xff] }
 0x906   :  { %v1487_v40 = vsel %vm1486_vm12, %v1482_v38, 0.0  ;;  %v4085_v18 = vpack.c.bf16 %v1524_v56, %v1523_v60 }
 0x907   :  { %1488 = vadd.xlane.f32.xlu1 %v1487_v40  ;;  %v1483_v42 = vsel %vm387_vm1, %v1481_v39, 0.0 }
 0x908   :  { %1484 = vadd.xlane.f32.xlu0 %v1483_v42  ;;  %4086 = vmatprep.subr.bf16.mxu0 %v4085_v18  ;;  %v1635_v42 = vld [vmem:[%s5303_s16 + $0x10] sm:$0xff] }
 0x909   :  { %4088 = vmatpush3.bf16.msra.mxu0 %v4085_v18 }
 0x90a   :  { %4090 = vmatprep.subr.bf16.mxu0 %v4089_v7 }
 0x90d   :  { %4092 = vmatpush3.bf16.msra.mxu0 %v4089_v7 }
 0x994   :  { %v1489_v43 = vpop.xlane.xlu1 %1488 }
 0x995   :  { %v1492_v45 = vmul.f32 0.03125, %v1489_v43  ;;  %v1485_v46 = vpop.xlane.xlu0 %1484  ;;  %v1636_v43 = vld [vmem:[%s5303_s16 + $0x18] sm:$0xff] }
 0x996   :  { %v1491_v19 = vmul.f32 0.03125, %v1485_v46  ;;  %v1637_v46 = vld [vmem:[%s5303_s16 + $0x20] sm:$0xff] }
 0x997   :  { %v1494_v48 = vsub.f32 %v1482_v38, %v1492_v45  ;;  %v1633_v38 = vld [vmem:[%s5303_s16] sm:$0xff]  ;;  %v4097_v45 = vpack.c.bf16 %v1636_v43, %v1635_v42 }
 0x998   :  { %v1493_v49 = vsub.f32 %v1481_v39, %v1491_v19  ;;  %v1634_v39 = vld [vmem:[%s5303_s16 + $0x8] sm:$0xff] }
 0x999   :  { %v1496_v53 = vmul.f32 %v1494_v48, %v1494_v48  ;;  %v4093_v40 = vpack.c.bf16 %v1634_v39, %v1633_v38  ;;  %v1638_v19 = vld [vmem:[%s5303_s16 + $0x28] sm:$0xff]  ;;  %v1643_v39 = vsub.s32 3, %v4934_v30 }
 0x99a   :  { %v1495_v50 = vmul.f32 %v1493_v49, %v1493_v49 }
 0x99b   :  { %v1500_v61 = vsel %vm1486_vm12, %v1496_v53, 0.0  ;;  %4094 = vmatprep.subr.bf16.mxu1 %v4093_v40  ;;  %v3349_v53 = vld [vmem:[%s5302_s15] ss:$0 sm:$0xff] }
 0x99c   :  { %v1497_v52 = vsel %vm387_vm1, %v1495_v50, 0.0  ;;  %4096 = vmatpush3.bf16.msra.mxu1 %v4093_v40  ;;  %v1640_v50 = vld [vmem:[%s5303_s16 + $0x38] sm:$0xff]  ;;  %v1644_v40 = vrot.slane %v4942_v32, %v1643_v39 }
 0x99d   :  { %1498 = vadd.xlane.f32.xlu0 %v1497_v52  ;;  %4098 = vmatprep.subr.bf16.mxu1 %v4097_v45 }
 0x9a0   :  { %4100 = vmatpush3.bf16.msra.mxu1 %v4097_v45 }
 0x9a1   :  { %1501 = vadd.xlane.f32.xlu0 %v1500_v61 }
 0xa2a   :  { %v1499_v13 = vpop.xlane.xlu0 %1498 }
 0xa2b   :  { %v1503_v14 = vmul.f32 0.03125, %v1499_v13 }
 0xa2d   :  { %v1505_v15 = vadd.f32 1e-05, %v1503_v14 }
 0xa2e   :  { %v1502_v16 = vpop.xlane.xlu0 %1501 }
 0xa2f   :  { %4256 = vrsqrt.f32 %v1505_v15  ;;  %v1504_v17 = vmul.f32 0.03125, %v1502_v16 }
 0xa31   :  { %v1506_v21 = vadd.f32 1e-05, %v1504_v17 }
 0xa33   :  { %4258 = vrsqrt.f32 %v1506_v21 }
 0xa39   :  { %v4257_v24 = vpop.eup %4256 }
 0xa3a   :  { %v1509_v25 = vmul.f32 %v4257_v24, %v1493_v49  ;;  %v1639_v49 = vld [vmem:[%s5303_s16 + $0x30] sm:$0xff] }
 0xa3b   :  { %v4105_v52 = vpack.c.bf16 %v1640_v50, %v1639_v49 }
 0xa3c   :  { %v1515_v29 = vmul.f32 %v1514_v62, %v1509_v25 }
 0xa3d   :  { %v4259_v33 = vpop.eup %4258 }
 0xa3e   :  { %v1510_v34 = vmul.f32 %v4259_v33, %v1494_v48  ;;  %v4973_v35 = vadd.f32 %v1520_v28, %v1515_v29  ;;  %v4101_v48 = vpack.c.bf16 %v1638_v19, %v1637_v46 }
 0xa40   :  { %v1516_v36 = vmul.f32 %v1514_v62, %v1510_v34  ;;  %3767 = vmatprep.mubr.msk.f32.mxu0 %vm387_vm1, %v4973_v35  ;;  %4102 = vmatprep.subr.bf16.mxu1 %v4101_v48 }
 0xa41   :  { %4104 = vmatpush3.bf16.msra.mxu1 %v4101_v48 }
 0xa42   :  { %v1522_v37 = vadd.f32 %v1520_v28, %v1516_v36  ;;  %4106 = vmatprep.subr.bf16.mxu1 %v4105_v52 }
 0xa44   :  { %3768 = vmatmul.mubr.msk.f32.vlgmr.msra.gmra.mrb[18].mxu0 %vm387_vm1, %v1522_v37 }
 0xa45   :  { %4108 = vmatpush3.bf16.msra.mxu1 %v4105_v52 }
 0xa46   :  { %4126 = vmatprep.subr.bf16.mxu1 %v4686_v55 }
 0xb17   :  { %v3769_v61 = vpop.f32.mrb[18].mxu0 }
 0xb18   :  { %v1612_v60 = vadd.f32 %v3769_v61, %v3349_v53  ;;  %v1606_v56 = vpop.f32.mrb[19].mxu0 }
 0xb19   :  { %v1607_v18 = vadd.f32 %v3349_v53, %v1606_v56 }
 0xb1a   :  { %v1616_v47 = vmul.f32 %v1612_v60, %v1612_v60 }
 0xb1b   :  { %v1615_v58 = vmul.f32 %v1607_v18, %v1607_v18 }
 0xb1c   :  { %v1618_v7 = vmul.f32 %v1616_v47, %v1612_v60 }
 0xb1d   :  { %v1617_v13 = vmul.f32 %v1615_v58, %v1607_v18 }
 0xb1e   :  { %v1620_v14 = vmul.f32 0.044715, %v1618_v7 }
 0xb1f   :  { %v1619_v15 = vmul.f32 0.044715, %v1617_v13  ;;  %v3356_v13 = vld [vmem:[%s5297_s10 + $0x28] sm:$0xff] }
 0xb20   :  { %v1622_v16 = vadd.f32 %v1620_v14, %v1612_v60 }
 0xb21   :  { %v1621_v17 = vadd.f32 %v1619_v15, %v1607_v18  ;;  %v3357_v15 = vld [vmem:[%s5297_s10 + $0x30] sm:$0xff] }
 0xb22   :  { %v1624_v21 = vmul.f32 0.7978846, %v1622_v16  ;;  %v3358_v16 = vld [vmem:[%s5297_s10 + $0x38] sm:$0xff] }
 0xb23   :  { %v1623_v62 = vmul.f32 0.7978846, %v1621_v17  ;;  %v4113_v17 = vpack.c.bf16 %v3358_v16, %v3357_v15 }
 0xb24   :  { %4260 = vtanh.f32 %v1624_v21 }
 0xb25   :  { %4262 = vtanh.f32 %v1623_v62 }
 0xb2e   :  { %v4261_v24 = vpop.eup %4260 }
 0xb2f   :  { %v4263_v25 = vpop.eup %4262  ;;  %v1628_v28 = vadd.f32 1.0, %v4261_v24 }
 0xb30   :  { %v1627_v29 = vadd.f32 1.0, %v4263_v25 }
 0xb31   :  { %v1630_v33 = vmul.f32 0.5, %v1628_v28 }
 0xb32   :  { %v1629_v34 = vmul.f32 0.5, %v1627_v29 }
 0xb33   :  { %v1632_v38 = vmul.f32 %v1630_v33, %v1612_v60  ;;  %v1757_v33 = vsub.s32 4, %v4934_v30 }
 0xb34   :  { %v1631_v36 = vmul.f32 %v1629_v34, %v1607_v18  ;;  %v1763_v34 = vsub.s32 5, %v4934_v30 }
 0xb36   :  { %3786 = vmatprep.mubr.msk.f32.mxu1 %vm1645_vm13, %v1631_v36  ;;  %v1758_v36 = vrot.slane %v4942_v32, %v1757_v33 }
 0xb37   :  { %3787 = vmatmul.mubr.msk.f32.vlgmr.msra.gmra.mrb[12].mxu1 %vm1645_vm13, %v1632_v38 }
 0xb38   :  { %4128 = vmatpush3.bf16.msra.mxu1 %v4686_v55 }
 0xb39   :  { %4130 = vmatprep.subr.bf16.mxu1 %v4714_v0 }
 0xb3c   :  { %4132 = vmatpush3.bf16.msra.mxu1 %v4714_v0 }
 0xb3d   :  { %4148 = vmatprep.subr.bf16.mxu1 %v4823_v3 }
 0xc0a   :  { %v3788_v42 = vpop.f32.mrb[12].mxu1 }
 0xc0b   :  { %v1724_v43 = vadd.f32 %v3788_v42, %v1644_v40  ;;  %v1718_v45 = vpop.f32.mrb[13].mxu1 }
 0xc0c   :  { %v1719_v46 = vadd.f32 %v1718_v45, %v1644_v40  ;;  %v1764_v45 = vrot.slane %v4942_v32, %v1763_v34  ;;  %v3360_v32 = vld [vmem:[%s5298_s11 + $0x1] ss:$0 sm:$0xff]  ;;  %s4333_s11 = smov [#allocation2]  }
 0xc0d   :  { %v1728_v19 = vadd.f32 %v1724_v43, %v1522_v37 }
 0xc0e   :  { %v1727_v48 = vadd.f32 %v1719_v46, %v4973_v35  ;;  %v3355_v35 = vld [vmem:[%s5297_s10 + $0x20] sm:$0xff] }
 0xc0f   :  { %v1732_v49 = vsel %vm1486_vm12, %v1728_v19, 0.0  ;;  %v4109_v14 = vpack.c.bf16 %v3356_v13, %v3355_v35 }
 0xc10   :  { %1733 = vadd.xlane.f32.xlu0 %v1732_v49  ;;  %v1729_v50 = vsel %vm387_vm1, %v1727_v48, 0.0 }
 0xc11   :  { %1730 = vadd.xlane.f32.xlu1 %v1729_v50  ;;  %4110 = vmatprep.subr.bf16.mxu0 %v4109_v14 }
 0xc12   :  { %4112 = vmatpush3.bf16.msra.mxu0 %v4109_v14 }
 0xc13   :  { %4114 = vmatprep.subr.bf16.mxu0 %v4113_v17 }
 0xc16   :  { %4116 = vmatpush3.bf16.msra.mxu0 %v4113_v17 }
 0xc17   :  { %4118 = vmatprep.subr.bf16.mxu0 %v4686_v55 }
 0xc9d   :  { %v1734_v52 = vpop.xlane.xlu0 %1733 }
 0xc9e   :  { %v1736_v53 = vmul.f32 0.03125, %v1734_v52  ;;  %v1731_v61 = vpop.xlane.xlu1 %1730 }
 0xc9f   :  { %v1735_v60 = vmul.f32 0.03125, %v1731_v61 }
 0xca0   :  { %v1738_v56 = vsub.f32 %v1728_v19, %v1736_v53 }
 0xca1   :  { %v1737_v18 = vsub.f32 %v1727_v48, %v1735_v60 }
 0xca2   :  { %v1740_v47 = vmul.f32 %v1738_v56, %v1738_v56 }
 0xca3   :  { %v1739_v58 = vmul.f32 %v1737_v18, %v1737_v18 }
 0xca4   :  { %v1744_v7 = vsel %vm1486_vm12, %v1740_v47, 0.0 }
 0xca5   :  { %1745 = vadd.xlane.f32.xlu0 %v1744_v7  ;;  %v1741_v37 = vsel %vm387_vm1, %v1739_v58, 0.0 }
 0xca6   :  { %1742 = vadd.xlane.f32.xlu1 %v1741_v37 }
 0xd32   :  { %v1746_v21 = vpop.xlane.xlu0 %1745 }
 0xd33   :  { %v1748_v62 = vmul.f32 0.03125, %v1746_v21  ;;  %v1743_v24 = vpop.xlane.xlu1 %1742 }
 0xd34   :  { %v1747_v25 = vmul.f32 0.03125, %v1743_v24 }
 0xd35   :  { %v1750_v28 = vadd.f32 1e-05, %v1748_v62 }
 0xd36   :  { %v1749_v29 = vadd.f32 1e-05, %v1747_v25 }
 0xd37   :  { %4264 = vrsqrt.f32 %v1750_v28 }
 0xd38   :  { %4266 = vrsqrt.f32 %v1749_v29 }
 0xd41   :  { %v4265_v38 = vpop.eup %4264 }
 0xd42   :  { %v4267_v40 = vpop.eup %4266  ;;  %v1754_v42 = vmul.f32 %v4265_v38, %v1738_v56 }
 0xd43   :  { %v1753_v43 = vmul.f32 %v4267_v40, %v1737_v18 }
 0xd44   :  { %v1760_v46 = vmul.f32 %v1758_v36, %v1754_v42 }
 0xd45   :  { %v1759_v19 = vmul.f32 %v1758_v36, %v1753_v43 }
 0xd46   :  { %v5044_v49 = vadd.f32 %v1764_v45, %v1760_v46 }
 0xd47   :  { %v5042_v48 = vadd.f32 %v1764_v45, %v1759_v19 }
 0xd49   :  { %3797 = vmatprep.mubr.msk.f32.mxu0 %vm387_vm1, %v5042_v48 }
 0xd4a   :  { %3798 = vmatmul.mubr.msk.f32.vlgmr.msra.gmra.mrb[20].mxu0 %vm387_vm1, %v5044_v49 }
 0xd4b   :  { %4120 = vmatpush3.bf16.msra.mxu0 %v4686_v55 }
 0xd4c   :  { %4122 = vmatprep.subr.bf16.mxu0 %v4714_v0 }
 0xd4f   :  { %4124 = vmatpush3.bf16.msra.mxu0 %v4714_v0 }
 0xe1d   :  { %v3799_v50 = vpop.f32.mrb[20].mxu0 }
 0xe1e   :  { %v1860_v52 = vadd.f32 %v3799_v50, %v3360_v32  ;;  %v1854_v53 = vpop.f32.mrb[21].mxu0 }
 0xe1f   :  { %v1855_v61 = vadd.f32 %v3360_v32, %v1854_v53 }
 0xe20   :  { %1954 = vrot.lane.b32.xlu0 %v1860_v52, %s4326_s6  ;;  %v1864_v18 = vmul.f32 %v1860_v52, %v4684_v54  ;;  %v1951_v24 = vmul.f32 %v1860_v52, %v4771_v27 }
 0xe21   :  { %1952 = vrot.lane.b32.xlu1 %v1855_v61, %s4326_s6  ;;  %3808 = vmatprep.mubr.msk.f32.mxu0 %vm387_vm1, %v1855_v61  ;;  %v4235_v60 = vpack.i.bf16 %v1860_v52, %v1855_v61  ;;  %v1863_v7 = vmul.f32 %v1855_v61, %v4671_v51  ;;  %v1950_v54 = vmul.f32 %v1855_v61, %v4769_v26 }
 0xe22   :  { %3809 = vmatmul.mubr.msk.f32.vlgmr.msra.gmra.mrb[22].mxu0 %vm387_vm1, %v1860_v52 }
 0xe92   :  { %v1955_v56 = vpop.permute.xlu0 %1954 }
 0xe93   :  { %v1953_v55 = vpop.permute.xlu1 %1952 }
 0xe94   :  { %3819 = vmatprep.mubr.msk.f32.mxu1 %vm387_vm1, %v1953_v55 }
 0xe95   :  { %3820 = vmatmul.mubr.msk.f32.vlgmr.msra.gmra.mrb[14].mxu1 %vm387_vm1, %v1955_v56 }
 0xe96   :  { %4150 = vmatpush3.bf16.msra.mxu1 %v4823_v3 }
 0xe97   :  { %4152 = vmatprep.subr.bf16.mxu1 %v4832_v5 }
 0xe9a   :  { %4154 = vmatpush3.bf16.msra.mxu1 %v4832_v5 }
 0xef5   :  { %v3810_v0 = vpop.f32.mrb[22].mxu0 }
 0xef6   :  { %v1947_v47 = vmul.f32 %v3810_v0, %v4742_v10  ;;  %v1937_v58 = vpop.f32.mrb[23].mxu0 }
 0xef7   :  { %v1946_v37 = vmul.f32 %v1937_v58, %v4747_v11 }
 0xef8   :  { %v5069_v35 = vadd.f32 %v1947_v47, %v1864_v18 }
 0xef9   :  { %v5071_v13 = vadd.f32 %v1946_v37, %v1863_v7 }
 0xefa   :  { %vm2048_vm2 = vcmp.gt.f32.partialorder %v5069_v35, 0.0 }
 0xefb   :  { %vm2047_vm0 = vcmp.gt.f32.partialorder %v5071_v13, 0.0 }
 0xf68   :  { %v3821_v14 = vpop.f32.mrb[14].mxu1 }
 0xf69   :  { %v2026_v15 = vpop.f32.mrb[15].mxu1  ;;  %v2036_v17 = vmul.f32 %v3821_v14, %v4742_v10 }
 0xf6a   :  { %v2035_v16 = vmul.f32 %v2026_v15, %v4747_v11 }
 0xf6c   :  { %2039 = vrot.lane.b32.xlu1 %v2035_v16, %s4325_s2 }
 0xf70   :  { %2041 = vrot.lane.b32.xlu1 %v2036_v17, %s4325_s2  ;;  %s3308_s2 = sshll.u32 %s4333_s11, 4  ;;  %s3309_s2 = int_to_ptr.vmem [resolvable:$true] %s3308_s2 }
 0xf71   :  { %p4306_p1 = scmp.lt.s32.totalorder %s3309_s2, %s3309_s2 }
 0xfde   :  { %v2040_v21 = vpop.permute.xlu1 %2039 }
 0xfdf   :  { %v2045_v51 = vadd.f32 %v2040_v21, %v1950_v54 }
 0xfe1   :  { %v2061_v62 = vmul.f32 1.442695, %v2045_v51  ;;  %v2059_v36 = vadd.f32 1.0, %v2045_v51  ;;  %vm2057_vm14 = vcmp.gt.f32.partialorder %v2045_v51, 0.0  ;;  %v2051_v51 = vmul.f32 1.442695, %v5071_v13 }
 0xfe2   :  { %v2042_v25 = vpop.permute.xlu1 %2041 }
 0xfe3   :  { %4268 = vpow2.f32 %v2061_v62  ;;  %v2046_v28 = vadd.f32 %v2042_v25, %v1951_v24 }
 0xfe5   :  { %v2063_v29 = vmul.f32 1.442695, %v2046_v28  ;;  %v2060_v40 = vadd.f32 1.0, %v2046_v28  ;;  %vm2058_vm15 = vcmp.gt.f32.partialorder %v2046_v28, 0.0 }
 0xfe7   :  { %4270 = vpow2.f32 %v2063_v29  ;;  %v2053_v29 = vmul.f32 1.442695, %v5069_v35 }
 0xfe8   :  { %4272 = vpow2.f32 %v2051_v51 }
 0xfe9   :  { %4274 = vpow2.f32 %v2053_v29 }
 0xfed   :  { %v4269_v11 = vpop.eup %4268 }
 0xfee   :  { %v2065_v38 = vsel %vm2057_vm14, %v2059_v36, %v4269_v11  ;;  %v2049_v36 = vadd.f32 1.0, %v5071_v13 }
 0xfef   :  { %v2067_v10 = vmul.f32 %v2065_v38, %v4780_v44  ;;  %v2402_v26 = vmul.f32 %v2065_v38, %v4837_v6 }
 0xff1   :  { %v4271_v42 = vpop.eup %4270  ;;  %2071 = vrot.lane.b32.xlu0 %v2067_v10, %s4326_s6  ;;  %v2217_v46 = vsel %vm845_vm5, %v2067_v10, 0.0  ;;  %v2545_v44 = vsel %vm845_vm5, %v2402_v26, 0.0 }
 0xff2   :  { %v2066_v43 = vsel %vm2058_vm15, %v2060_v40, %v4271_v42  ;;  %v4273_v28 = vpop.eup %4272  ;;  %v2050_v40 = vadd.f32 1.0, %v5069_v35 }
 0xff3   :  { %v2068_v27 = vmul.f32 %v2066_v43, %v4777_v41  ;;  %v2403_v45 = vmul.f32 %v2066_v43, %v4842_v8  ;;  %v2055_v38 = vsel %vm2047_vm0, %v2049_v36, %v4273_v28  ;;  %v4275_v10 = vpop.eup %4274 }
 0xff5   :  { %2073 = vrot.lane.b32.xlu1 %v2068_v27, %s4326_s6  ;;  %v2218_v19 = vsel %vm847_vm4, %v2068_v27, 0.0  ;;  %4236 = vrot.lane.b32.xlu0 %v4235_v60, %s4328_s23  ;;  %v2546_v32 = vsel %vm847_vm4, %v2403_v45, 0.0  ;;  %vm3300_vm4 = vcmask 25600  }
 0xff6   :  { %v2219_v50 = vadd.f32 %v2218_v19, %v2217_v46  ;;  %v2547_v52 = vadd.f32 %v2546_v32, %v2545_v44 }
 0xff8   :  { %v2220_v0 = vrot.slane %v2219_v50, 4  ;;  %v2548_v37 = vrot.slane %v2547_v52, 4 }
 0xff9   :  { %2406 = vrot.lane.b32.xlu0 %v2402_v26, %s4326_s6  ;;  %v5113_v26 = vsel %vm2048_vm2, %v2050_v40, %v4275_v10  ;;  %v3388_v10 = vld [vmem:[%s5299_s12 + $0x38] sm:$0xff] }
 0xffa   :  { %v2221_v18 = vadd.f32 %v2220_v0, %v2219_v50  ;;  %v2549_v15 = vadd.f32 %v2548_v37, %v2547_v52 }
 0xffc   :  { %v2222_v47 = vrot.slane %v2221_v18, 2  ;;  %v2550_v16 = vrot.slane %v2549_v15, 2 }
 0xffd   :  { %2408 = vrot.lane.b32.xlu0 %v2403_v45, %s4326_s6 }
 0xffe   :  { %v2223_v58 = vadd.f32 %v2222_v47, %v2221_v18  ;;  %v2551_v17 = vadd.f32 %v2550_v16, %v2549_v15 }
0x1000   :  { %v2224_v7 = vrot.slane %v2223_v58, 1  ;;  %v2552_v54 = vrot.slane %v2551_v17, 1 }
0x1002   :  { %v2225_v14 = vadd.f32 %v2224_v7, %v2223_v58  ;;  %v2553_v21 = vadd.f32 %v2552_v54, %v2551_v17 }
0x1063   :  { %v2072_v41 = vpop.permute.xlu0 %2071 }
0x1064   :  { %2077 = vxpose.xlu1.b32.start [1/2] (short) (narrow) %v2072_v41, 32 }
0x1067   :  { %v2074_v6 = vpop.permute.xlu1 %2073  ;;  %v4237_v8 = vpop.permute.xlu0 %4236 }
0x1068   :  { %v4239_v53 = vunpack.i.h.bf16 %v4237_v8  ;;  %v4238_v61 = vunpack.i.l.bf16 %v4237_v8  ;;  %2078 = vxpose.xlu1.b32.end [2/2] (short) (narrow) %v2074_v6, 32 }
0x106a   :  { %v5092_v55 = vpack.c.bf16 %v4239_v53, %v4238_v61 }
0x106b   :  { %v2407_v60 = vpop.permute.xlu0 %2406 }
0x106c   :  { %2412 = vxpose.xlu0.b32.start [1/2] (short) (narrow) %v2407_v60, 32  ;;  %4135 = vmatprep.subr.msk.bf16.mxu0 %vm4794_vm8, %v5092_v55 }
0x106d   :  { %4138 = vmatpush3.bf16.msk.msra.mxu0 %vm4794_vm8, %v5092_v55 }
0x106f   :  { %v2409_v56 = vpop.permute.xlu0 %2408 }
0x1070   :  { %2413 = vxpose.xlu0.b32.end [2/2] (short) (narrow) %v2409_v56, 32 }
0x108e   :  { %2308 = vrot.lane.b32.xlu1 %v2225_v14, %s4326_s6 }
0x10a1   :  { %2630 = vrot.lane.b32.xlu0 %v2553_v21, %s4326_s6 }
0x10e4   :  { %v2093_v62 = vpop.trf.xlu1 }
0x10e5   :  { %3826 = vmatprep.mubr.msk.f32.mxu0 %vm740_vm9, %v2093_v62 }
0x10e8   :  { %v2094_v24 = vpop.trf.xlu1 }
0x10e9   :  { %3827 = vmatmul.mubr.msk.f32.vlgmr.msra.gmra.mrb[24].mxu0 %vm740_vm9, %v2094_v24 }
0x10ec   :  { %v2095_v25 = vpop.trf.xlu1  ;;  %v2428_v13 = vpop.trf.xlu0 }
0x10ed   :  { %3829 = vmatprep.mubr.msk.f32.mxu0 %vm740_vm9, %v2095_v25  ;;  %v4300_v25 = vld [vmem:[%s5294_s7 + $0x10] sm:$0xff] }
0x10f0   :  { %v2096_v11 = vpop.trf.xlu1  ;;  %v2429_v35 = vpop.trf.xlu0 }
0x10f1   :  { %3830 = vmatmul.mubr.msk.f32.gmra.mrb[26].mxu0 %vm740_vm9, %v2096_v11 }
0x10f2   :  { %3840 = vmatprep.mubr.msk.f32.mxu0 %vm387_vm1, %v2055_v38 }
0x10f4   :  { %v2430_v6 = vpop.trf.xlu0 }
0x10f8   :  { %v2431_v61 = vpop.trf.xlu0 }
0x1100   :  { %v2309_v42 = vpop.permute.xlu1 %2308 }
0x1101   :  { %v2311_v43 = vmul.f32 %v2309_v42, %v2055_v38  ;;  %v2312_v27 = vmul.f32 %v2309_v42, %v5113_v26 }
0x1103   :  { %3851 = vmatprep.mubr.msk.f32.mxu1 %vm387_vm1, %v2311_v43 }
0x1104   :  { %3852 = vmatmul.mubr.msk.f32.vlgmr.msra.gmra.mrb[16].mxu1 %vm387_vm1, %v2312_v27 }
0x1105   :  { %3872 = vmatprep.mubr.msk.f32.mxu1 %vm387_vm1, %v2055_v38 }
0x11bc   :  { %v3828_v45 = vpop.f32.mrb[24].mxu0 }
0x11bd   :  { %v2214_v46 = vmul.f32 %v3828_v45, %v4814_v1  ;;  %v2194_v19 = vpop.f32.mrb[25].mxu0 }
0x11be   :  { %v2213_v44 = vmul.f32 %v2194_v19, %v4809_v63 }
0x11c0   :  { %v4139_v32 = vpack.c.bf16 %v2214_v46, %v2213_v44 }
0x11c2   :  { %4140 = vmatprep.subr.bf16.mxu0 %v4139_v32 }
0x11c3   :  { %4142 = vmatpush3.bf16.msra.mxu0 %v4139_v32 }
0x11c4   :  { %v3831_v50 = vpop.f32.mrb[26].mxu0 }
0x11c5   :  { %v2216_v52 = vmul.f32 %v3831_v50, %v4828_v4  ;;  %v2204_v41 = vpop.f32.mrb[27].mxu0 }
0x11c6   :  { %v2215_v8 = vmul.f32 %v2204_v41, %v4819_v2  ;;  %v2631_v2 = vpop.permute.xlu0 %2630 }
0x11c7   :  { %v2633_v60 = vmul.f32 %v2631_v2, %v2055_v38  ;;  %v3387_v38 = vld [vmem:[%s5299_s12 + $0x30] sm:$0xff] }
0x11c8   :  { %v4143_v53 = vpack.c.bf16 %v2216_v52, %v2215_v8  ;;  %v4181_v40 = vpack.c.bf16 %v3388_v10, %v3387_v38 }
0x11ca   :  { %4144 = vmatprep.subr.bf16.mxu0 %v4143_v53 }
0x11cb   :  { %4146 = vmatpush3.bf16.msra.mxu0 %v4143_v53 }
0x11cc   :  { %4157 = vmatprep.subr.msk.bf16.mxu0 %vm4794_vm8, %v5092_v55 }
0x11ce   :  { %3841 = vmatmul.mubr.msk.f32.vlgmr.msra.gmra.mrb[28].mxu0 %vm387_vm1, %v5113_v26 }
0x11cf   :  { %4160 = vmatpush3.bf16.msk.msra.mxu0 %vm4794_vm8, %v5092_v55  ;;  %3858 = vmatprep.mubr.msk.f32.mxu0 %vm740_vm9, %v2428_v13  ;;  %v2634_v55 = vmul.f32 %v2631_v2, %v5113_v26 }
0x11d0   :  { %4170 = vmatprep.subr.bf16.mxu0 %v4823_v3 }
0x11d2   :  { %3859 = vmatmul.mubr.msk.f32.vlgmr.msra.gmra.mrb[30].mxu0 %vm740_vm9, %v2429_v35 }
0x11d3   :  { %4172 = vmatpush3.bf16.msra.mxu0 %v4823_v3  ;;  %3861 = vmatprep.mubr.msk.f32.mxu0 %vm740_vm9, %v2430_v6  ;;  %v5171_v6 = vld [vmem:[%s5300_s13 + $0x8] sm:$0x3f] }
0x11d4   :  { %4174 = vmatprep.subr.bf16.mxu0 %v4832_v5 }
0x11d6   :  { %3862 = vmatmul.mubr.msk.f32.gmra.mrb[32].mxu0 %vm740_vm9, %v2431_v61 }
0x11d7   :  { %v3853_v56 = vpop.f32.mrb[16].mxu1  ;;  %4176 = vmatpush3.bf16.msra.mxu0 %v4832_v5  ;;  %3883 = vmatprep.mubr.msk.f32.mxu0 %vm387_vm1, %v2633_v60 }
0x11d8   :  { %v2385_v0 = vpop.f32.mrb[17].mxu1  ;;  %v2391_v18 = vadd.f32 1e-06, %v3853_v56 }
0x11d9   :  { %v2386_v47 = vadd.f32 1e-06, %v2385_v0 }
0x11da   :  { %3884 = vmatmul.mubr.msk.f32.vlgmr.msra.gmra.mrb[34].mxu0 %vm387_vm1, %v2634_v55  ;;  %4276 = vrcp.f32 %v2391_v18 }
0x11db   :  { %4278 = vrcp.f32 %v2386_v47 }
0x11e4   :  { %v4277_v3 = vpop.eup %4276 }
0x11e5   :  { %v4279_v7 = vpop.eup %4278 }
0x12a1   :  { %v3842_v58 = vpop.f32.mrb[28].mxu0 }
0x12a2   :  { %v2397_v37 = vmul.f32 %v4277_v3, %v3842_v58  ;;  %v2298_v14 = vpop.f32.mrb[29].mxu0 }
0x12a3   :  { %v2395_v15 = vmul.f32 %v4279_v7, %v2298_v14  ;;  %v3392_v14 = vld [vmem:[%s5301_s14 + $0x28] sm:$0xff] }
0x12a4   :  { %v2399_v44 = vmul.f32 %v2397_v37, %v4924_v12  ;;  %v2732_v12 = vrot.slane %v5171_v6, %v4937_v31 }
0x12a5   :  { %v3860_v16 = vpop.f32.mrb[30].mxu0  ;;  %v2398_v32 = vmul.f32 %v2395_v15, %v4920_v57 }
0x12a6   :  { %v2542_v5 = vmul.f32 %v3860_v16, %v4814_v1  ;;  %v2522_v17 = vpop.f32.mrb[31].mxu0  ;;  %v3386_v1 = vld [vmem:[%s5299_s12 + $0x28] sm:$0xff]  ;;  %v3393_v16 = vld [vmem:[%s5301_s14 + $0x30] sm:$0xff] }
0x12a7   :  { %v2541_v54 = vmul.f32 %v2522_v17, %v4809_v63  ;;  %v3385_v63 = vld [vmem:[%s5299_s12 + $0x20] sm:$0xff] }
0x12a9   :  { %v4161_v21 = vpack.c.bf16 %v2542_v5, %v2541_v54  ;;  %v3863_v51 = vpop.f32.mrb[32].mxu0  ;;  %v3394_v5 = vld [vmem:[%s5301_s14 + $0x38] sm:$0xff] }
0x12aa   :  { %v2544_v62 = vmul.f32 %v3863_v51, %v4828_v4  ;;  %v2532_v24 = vpop.f32.mrb[33].mxu0  ;;  %v4177_v4 = vpack.c.bf16 %v3386_v1, %v3385_v63  ;;  %v4189_v17 = vpack.c.bf16 %v3394_v5, %v3393_v16 }
0x12ab   :  { %v2543_v28 = vmul.f32 %v4300_v25, %v2532_v24  ;;  %4162 = vmatprep.subr.bf16.mxu1 %v4161_v21 }
0x12ac   :  { %4164 = vmatpush3.bf16.msra.mxu1 %v4161_v21 }
0x12ad   :  { %v4165_v29 = vpack.c.bf16 %v2544_v62, %v2543_v28  ;;  %v3885_v36 = vpop.f32.mrb[34].mxu0  ;;  %v2845_v28 = vrot.slane %v5171_v6, %v4965_v22 }
0x12ae   :  { %v2707_v11 = vpop.f32.mrb[35].mxu0  ;;  %v2713_v42 = vadd.f32 1e-06, %v3885_v36 }
0x12af   :  { %4166 = vmatprep.subr.bf16.mxu1 %v4165_v29 }
0x12b0   :  { %4168 = vmatpush3.bf16.msra.mxu1 %v4165_v29  ;;  %4280 = vrcp.f32 %v2713_v42  ;;  %v3399_v42 = vld [vmem:[%s5303_s16 + $0x40] sm:$0xff] }
0x12b1   :  { %4178 = vmatprep.subr.bf16.mxu1 %v4177_v4 }
0x12b3   :  { %3873 = vmatmul.mubr.msk.f32.vlgmr.msra.gmra.mrb[18].mxu1 %vm387_vm1, %v5113_v26  ;;  %v2708_v26 = vadd.f32 1e-06, %v2707_v11  ;;  %v2851_v11 = vrot.slane %v5171_v6, %v1519_v23  ;;  %v3401_v23 = vld [vmem:[%s5303_s16 + $0x50] sm:$0xff] }
0x12b4   :  { %4180 = vmatpush3.bf16.msra.mxu1 %v4177_v4 }
0x12b5   :  { %4182 = vmatprep.subr.bf16.mxu1 %v4181_v40  ;;  %4282 = vrcp.f32 %v2708_v26  ;;  %v3400_v26 = vld [vmem:[%s5303_s16 + $0x48] sm:$0xff] }
0x12b8   :  { %4184 = vmatpush3.bf16.msra.mxu1 %v4181_v40 }
0x12ba   :  { %v4281_v43 = vpop.eup %4280 }
0x12bf   :  { %v4283_v13 = vpop.eup %4282 }
0x1386   :  { %v3874_v27 = vpop.f32.mrb[18].mxu1 }
0x1387   :  { %v2719_v45 = vmul.f32 %v4281_v43, %v3874_v27  ;;  %v2620_v46 = vpop.f32.mrb[19].mxu1  ;;  %v4193_v43 = vpack.c.bf16 %v3400_v26, %v3399_v42  ;;  %v3402_v27 = vld [vmem:[%s5303_s16 + $0x58] sm:$0xff] }
0x1388   :  { %v2717_v19 = vmul.f32 %v4283_v13, %v2620_v46  ;;  %v4197_v13 = vpack.c.bf16 %v3402_v27, %v3401_v23  ;;  %v3404_v46 = vld [vmem:[%s5303_s16 + $0x68] sm:$0xff]  ;;  %v3091_v23 = vrot.slane %v5171_v6, %v1757_v33 }
0x1389   :  { %v2721_v35 = vmul.f32 %v2719_v45, %v4926_v20  ;;  %4194 = vmatprep.subr.bf16.mxu1 %v4193_v43  ;;  %v3403_v45 = vld [vmem:[%s5303_s16 + $0x60] sm:$0xff] }
0x138a   :  { %v2720_v50 = vmul.f32 %v2717_v19, %v4922_v9  ;;  %v4201_v19 = vpack.c.bf16 %v3404_v46, %v3403_v45  ;;  %v3097_v46 = vrot.slane %v5171_v6, %v1763_v34 }
0x138b   :  { %v2723_v52 = vadd.f32 %v2721_v35, %v2399_v44  ;;  %v3405_v44 = vld [vmem:[%s5303_s16 + $0x70] sm:$0xff]  ;;  %v3406_v35 = vld [vmem:[%s5303_s16 + $0x78] sm:$0xff] }
0x138c   :  { %v2722_v41 = vadd.f32 %v2720_v50, %v2398_v32  ;;  %v4205_v32 = vpack.c.bf16 %v3406_v35, %v3405_v44  ;;  %v3396_v50 = vld [vmem:[%s5302_s15 + $0x1] ss:$0 sm:$0xff] }
0x138e   :  { %3894 = vmatprep.mubr.msk.f32.mxu1 %vm387_vm1, %v2722_v41 }
0x138f   :  { %3895 = vmatmul.mubr.msk.f32.vlgmr.msra.gmra.mrb[20].mxu1 %vm387_vm1, %v2723_v52 }
0x1390   :  { %4196 = vmatpush3.bf16.msra.mxu1 %v4193_v43 }
0x1391   :  { %4198 = vmatprep.subr.bf16.mxu1 %v4197_v13 }
0x1394   :  { %4200 = vmatpush3.bf16.msra.mxu1 %v4197_v13 }
0x1395   :  { %4202 = vmatprep.subr.bf16.mxu1 %v4201_v19 }
0x1398   :  { %4204 = vmatpush3.bf16.msra.mxu1 %v4201_v19 }
0x1399   :  { %4206 = vmatprep.subr.bf16.mxu1 %v4205_v32 }
0x139c   :  { %4208 = vmatpush3.bf16.msra.mxu1 %v4205_v32 }
0x1462   :  { %v3896_v8 = vpop.f32.mrb[20].mxu1 }
0x1463   :  { %v2811_v20 = vadd.f32 %v3896_v8, %v2732_v12  ;;  %v2805_v53 = vpop.f32.mrb[21].mxu1 }
0x1464   :  { %v2806_v57 = vadd.f32 %v2805_v53, %v2732_v12 }
0x1465   :  { %v2815_v9 = vadd.f32 %v2811_v20, %v5044_v49 }
0x1466   :  { %v2814_v61 = vadd.f32 %v2806_v57, %v5042_v48  ;;  %v3391_v48 = vld [vmem:[%s5301_s14 + $0x20] sm:$0xff] }
0x1467   :  { %v2819_v2 = vsel %vm1486_vm12, %v2815_v9, 0.0  ;;  %v4185_v15 = vpack.c.bf16 %v3392_v14, %v3391_v48  ;;  %v2978_v14 = vrot.slane %v5171_v6, %v1643_v39 }
0x1468   :  { %2820 = vadd.xlane.f32.xlu0 %v2819_v2  ;;  %v2816_v60 = vsel %vm387_vm1, %v2814_v61, 0.0 }
0x1469   :  { %2817 = vadd.xlane.f32.xlu1 %v2816_v60  ;;  %4186 = vmatprep.subr.bf16.mxu0 %v4185_v15 }
0x146a   :  { %4188 = vmatpush3.bf16.msra.mxu0 %v4185_v15 }
0x146b   :  { %4190 = vmatprep.subr.bf16.mxu0 %v4189_v17 }
0x146e   :  { %4192 = vmatpush3.bf16.msra.mxu0 %v4189_v17 }
0x14f5   :  { %v2821_v56 = vpop.xlane.xlu0 %2820 }
0x14f6   :  { %v2823_v55 = vmul.f32 0.03125, %v2821_v56  ;;  %v2818_v0 = vpop.xlane.xlu1 %2817 }
0x14f7   :  { %v2822_v18 = vmul.f32 0.03125, %v2818_v0 }
0x14f8   :  { %v2825_v47 = vsub.f32 %v2815_v9, %v2823_v55 }
0x14f9   :  { %v2824_v3 = vsub.f32 %v2814_v61, %v2822_v18 }
0x14fa   :  { %v2827_v37 = vmul.f32 %v2825_v47, %v2825_v47 }
0x14fb   :  { %v2826_v58 = vmul.f32 %v2824_v3, %v2824_v3 }
0x14fc   :  { %v2831_v49 = vsel %vm1486_vm12, %v2827_v37, 0.0 }
0x14fd   :  { %v2828_v7 = vsel %vm387_vm1, %v2826_v58, 0.0 }
0x14fe   :  { %2829 = vadd.xlane.f32.xlu1 %v2828_v7 }
0x1502   :  { %2832 = vadd.xlane.f32.xlu1 %v2831_v49 }
0x158b   :  { %v2830_v54 = vpop.xlane.xlu1 %2829 }
0x158c   :  { %v2834_v21 = vmul.f32 0.03125, %v2830_v54 }
0x158e   :  { %v2836_v51 = vadd.f32 1e-05, %v2834_v21 }
0x158f   :  { %v2833_v62 = vpop.xlane.xlu1 %2832 }
0x1590   :  { %4284 = vrsqrt.f32 %v2836_v51  ;;  %v2835_v24 = vmul.f32 0.03125, %v2833_v62 }
0x1592   :  { %v2837_v25 = vadd.f32 1e-05, %v2835_v24 }
0x1594   :  { %4286 = vrsqrt.f32 %v2837_v25 }
0x159a   :  { %v4285_v29 = vpop.eup %4284 }
0x159b   :  { %v2840_v36 = vmul.f32 %v4285_v29, %v2824_v3 }
0x159d   :  { %v2846_v63 = vmul.f32 %v2845_v28, %v2840_v36 }
0x159e   :  { %v4287_v1 = vpop.eup %4286 }
0x159f   :  { %v2841_v4 = vmul.f32 %v4287_v1, %v2825_v47  ;;  %v2852_v38 = vadd.f32 %v2851_v11, %v2846_v63 }
0x15a1   :  { %v2847_v10 = vmul.f32 %v2845_v28, %v2841_v4  ;;  %3905 = vmatprep.mubr.msk.f32.mxu0 %vm387_vm1, %v2852_v38 }
0x15a3   :  { %v2853_v40 = vadd.f32 %v2851_v11, %v2847_v10 }
0x15a5   :  { %3906 = vmatmul.mubr.msk.f32.vlgmr.msra.gmra.mrb[36].mxu0 %vm387_vm1, %v2853_v40 }
0x1678   :  { %v3907_v52 = vpop.f32.mrb[36].mxu0 }
0x1679   :  { %v2945_v41 = vadd.f32 %v3907_v52, %v3396_v50  ;;  %v2939_v12 = vpop.f32.mrb[37].mxu0 }
0x167a   :  { %v2940_v8 = vadd.f32 %v3396_v50, %v2939_v12 }
0x167b   :  { %v2949_v20 = vmul.f32 %v2945_v41, %v2945_v41 }
0x167c   :  { %v2948_v53 = vmul.f32 %v2940_v8, %v2940_v8 }
0x167d   :  { %v2951_v57 = vmul.f32 %v2949_v20, %v2945_v41 }
0x167e   :  { %v2950_v9 = vmul.f32 %v2948_v53, %v2940_v8 }
0x167f   :  { %v2953_v61 = vmul.f32 0.044715, %v2951_v57 }
0x1680   :  { %v2952_v2 = vmul.f32 0.044715, %v2950_v9 }
0x1681   :  { %v2955_v60 = vadd.f32 %v2953_v61, %v2945_v41  ;;  %v4330_v61 = vmov 0.0|0.0  }
0x1682   :  { %v2954_v56 = vadd.f32 %v2952_v2, %v2940_v8  ;;  %4209 = vmatprep.subr.bf16.mxu0 %v4330_v61  ;;  %v4332_v2 = vmov 0.0  }
0x1683   :  { %v2957_v55 = vmul.f32 0.7978846, %v2955_v60  ;;  %3931 = vmatprep.mubr.msk.f32.mxu0 %vm4331_vm3, %v4332_v2 }
0x1684   :  { %v2956_v0 = vmul.f32 0.7978846, %v2954_v56 }
0x1685   :  { %4288 = vtanh.f32 %v2957_v55 }
0x1686   :  { %4290 = vtanh.f32 %v2956_v0 }
0x168f   :  { %v4289_v18 = vpop.eup %4288 }
0x1690   :  { %v4291_v47 = vpop.eup %4290  ;;  %v2961_v3 = vadd.f32 1.0, %v4289_v18 }
0x1691   :  { %v2960_v58 = vadd.f32 1.0, %v4291_v47 }
0x1692   :  { %v2963_v7 = vmul.f32 0.5, %v2961_v3  ;;  %v3100_v3 = vld [vmem:[%s5304_s17] sm:$0x3] }
0x1693   :  { %v2962_v37 = vmul.f32 0.5, %v2960_v58  ;;  %v3130_v58 = vrot.slane %v3100_v3, %v4937_v31  ;;  %v3139_v31 = vld [vmem:[%s5307_s20] sm:$0x3] }
0x1694   :  { %v2965_v48 = vmul.f32 %v2963_v7, %v2945_v41 }
0x1695   :  { %v2964_v49 = vmul.f32 %v2962_v37, %v2940_v8 }
0x1697   :  { %3924 = vmatprep.mubr.msk.f32.mxu1 %vm1645_vm13, %v2964_v49  ;;  %v3136_v49 = vrot.slane %v3100_v3, %v4965_v22 }
0x1698   :  { %3925 = vmatmul.mubr.msk.f32.vlgmr.msra.gmra.mrb[22].mxu1 %vm1645_vm13, %v2965_v48 }
0x176b   :  { %v3926_v15 = vpop.f32.mrb[22].mxu1 }
0x176c   :  { %v3057_v16 = vadd.f32 %v3926_v15, %v2978_v14  ;;  %v3051_v5 = vpop.f32.mrb[23].mxu1 }
0x176d   :  { %v3052_v17 = vadd.f32 %v3051_v5, %v2978_v14 }
0x176e   :  { %v3061_v54 = vadd.f32 %v3057_v16, %v2853_v40 }
0x176f   :  { %v3060_v21 = vadd.f32 %v3052_v17, %v2852_v38 }
0x1770   :  { %v3065_v51 = vsel %vm1486_vm12, %v3061_v54, 0.0 }
0x1771   :  { %3066 = vadd.xlane.f32.xlu1 %v3065_v51  ;;  %v3062_v62 = vsel %vm387_vm1, %v3060_v21, 0.0 }
0x1772   :  { %3063 = vadd.xlane.f32.xlu0 %v3062_v62  ;;  %v3218_v62 = vld [vmem:[%s5305_s18 + $0x10] sm:$0xff] }
0x17fe   :  { %v3067_v24 = vpop.xlane.xlu1 %3066 }
0x17ff   :  { %v3069_v25 = vmul.f32 0.03125, %v3067_v24  ;;  %v3064_v28 = vpop.xlane.xlu0 %3063  ;;  %v3219_v24 = vld [vmem:[%s5305_s18 + $0x18] sm:$0xff] }
0x1800   :  { %v3068_v29 = vmul.f32 0.03125, %v3064_v28 }
0x1801   :  { %v3071_v36 = vsub.f32 %v3061_v54, %v3069_v25  ;;  %v3216_v54 = vld [vmem:[%s5305_s18] sm:$0xff]  ;;  %v4217_v25 = vpack.c.bf16 %v3219_v24, %v3218_v62 }
0x1802   :  { %v3070_v11 = vsub.f32 %v3060_v21, %v3068_v29  ;;  %v3217_v21 = vld [vmem:[%s5305_s18 + $0x8] sm:$0xff]  ;;  %v3411_v29 = vld [vmem:[%s5306_s19] ss:$0 sm:$0xff]  ;;  %s4301_s18 = scalar_lea.vmem %s3309_s2, 32 }
0x1803   :  { %v3073_v63 = vmul.f32 %v3071_v36, %v3071_v36  ;;  %v4214_v22 = vpack.c.bf16 %v3217_v21, %v3216_v54  ;;  %p4302_p0 = scmp.ne.s32.totalorder %s3309_s2, %s4301_s18  ;;  %p4307_p2 = scmp.lt.s32.totalorder %s4301_s18, %s4301_s18 }
0x1804   :  { %v3072_v39 = vmul.f32 %v3070_v11, %v3070_v11 }
0x1805   :  { %v3077_v1 = vsel %vm1486_vm12, %v3073_v63, 0.0  ;;  %p4308_p3 = por %p4307_p2, %p4306_p1 }
0x1806   :  { %3078 = vadd.xlane.f32.xlu1 %v3077_v1  ;;  %v3074_v4 = vsel %vm387_vm1, %v3072_v39, 0.0 }
0x1807   :  { %3075 = vadd.xlane.f32.xlu0 %v3074_v4  ;;  %p4309_p4 = pnand %p4308_p3, %p4302_p0 }
0x1893   :  { %v3079_v38 = vpop.xlane.xlu1 %3078 }
0x1894   :  { %v3081_v10 = vmul.f32 0.03125, %v3079_v38  ;;  %v3076_v40 = vpop.xlane.xlu0 %3075 }
0x1895   :  { %v3080_v42 = vmul.f32 0.03125, %v3076_v40 }
0x1896   :  { %v3083_v26 = vadd.f32 1e-05, %v3081_v10 }
0x1897   :  { %v3082_v43 = vadd.f32 1e-05, %v3080_v42 }
0x1898   :  { %4292 = vrsqrt.f32 %v3083_v26 }
0x1899   :  { %4294 = vrsqrt.f32 %v3082_v43 }
0x18a2   :  { %v4293_v27 = vpop.eup %4292 }
0x18a3   :  { %v4295_v13 = vpop.eup %4294  ;;  %v3087_v45 = vmul.f32 %v4293_v27, %v3071_v36 }
0x18a4   :  { %v3086_v19 = vmul.f32 %v4295_v13, %v3070_v11 }
0x18a5   :  { %v3093_v44 = vmul.f32 %v3091_v23, %v3087_v45 }
0x18a6   :  { %v3092_v35 = vmul.f32 %v3091_v23, %v3086_v19 }
0x18a7   :  { %v3099_v32 = vadd.f32 %v3097_v46, %v3093_v44 }
0x18a8   :  { %v3098_v50 = vadd.f32 %v3097_v46, %v3092_v35 }
0x18a9   :  { %v3104_v52 = vsel %vm1486_vm12, %v3099_v32, 0.0 }
0x18aa   :  { %3105 = vadd.xlane.f32.xlu1 %v3104_v52  ;;  %v3101_v41 = vsel %vm387_vm1, %v3098_v50, 0.0 }
0x18ab   :  { %3102 = vadd.xlane.f32.xlu0 %v3101_v41 }
0x1937   :  { %v3106_v12 = vpop.xlane.xlu1 %3105 }
0x1938   :  { %v3108_v33 = vmul.f32 0.03125, %v3106_v12  ;;  %v3103_v8 = vpop.xlane.xlu0 %3102 }
0x1939   :  { %v3107_v20 = vmul.f32 0.03125, %v3103_v8 }
0x193a   :  { %v3110_v53 = vsub.f32 %v3099_v32, %v3108_v33 }
0x193b   :  { %v3109_v57 = vsub.f32 %v3098_v50, %v3107_v20 }
0x193c   :  { %v3112_v30 = vmul.f32 %v3110_v53, %v3110_v53 }
0x193d   :  { %v3111_v9 = vmul.f32 %v3109_v57, %v3109_v57 }
0x193e   :  { %v3116_v34 = vsel %vm1486_vm12, %v3112_v30, 0.0 }
0x193f   :  { %3117 = vadd.xlane.f32.xlu1 %v3116_v34  ;;  %v3113_v6 = vsel %vm387_vm1, %v3111_v9, 0.0 }
0x1940   :  { %3114 = vadd.xlane.f32.xlu0 %v3113_v6 }
0x19cc   :  { %v3118_v60 = vpop.xlane.xlu1 %3117 }
0x19cd   :  { %v3120_v56 = vmul.f32 0.03125, %v3118_v60  ;;  %v3115_v55 = vpop.xlane.xlu0 %3114 }
0x19ce   :  { %v3119_v0 = vmul.f32 0.03125, %v3115_v55 }
0x19cf   :  { %v3122_v18 = vadd.f32 1e-05, %v3120_v56 }
0x19d0   :  { %v3121_v47 = vadd.f32 1e-05, %v3119_v0 }
0x19d1   :  { %4296 = vrsqrt.f32 %v3122_v18 }
0x19d2   :  { %4298 = vrsqrt.f32 %v3121_v47 }
0x19db   :  { %v4297_v7 = vpop.eup %4296 }
0x19dc   :  { %v4299_v37 = vpop.eup %4298  ;;  %v3126_v48 = vmul.f32 %v4297_v7, %v3110_v53 }
0x19dd   :  { %v3125_v14 = vmul.f32 %v4299_v37, %v3109_v57 }
0x19de   :  { %v3132_v15 = vmul.f32 %v3130_v58, %v3126_v48 }
0x19df   :  { %v3131_v16 = vmul.f32 %v3130_v58, %v3125_v14 }
0x19e0   :  { %v3138_v5 = vadd.f32 %v3136_v49, %v3132_v15 }
0x19e1   :  { %v3137_v17 = vadd.f32 %v3136_v49, %v3131_v16 }
0x19e3   :  { %v4210_v51 = vpack.c.bf16 %v3138_v5, %v3137_v17 }
0x19e5   :  { %4212 = vmatpush3.bf16.msk.msra.mxu0 %vm4794_vm8, %v4210_v51 }
0x19e6   :  { %4213 = vmatprep.subr.bf16.mxu0 %v4330_v61 }
0x19e8   :  { %3932 = vmatmul.mubr.msk.f32.vlgmr.msra.gmra.mrb[38].mxu0 %vm740_vm9, %v3139_v31 }
0x19e9   :  { %4215 = vmatpush3.bf16.msra.mxu0 %v4214_v22  ;;  %3942 = vmatprep.mubr.msk.f32.mxu0 %vm4331_vm3, %v4332_v2 }
0x19ea   :  { %4216 = vmatprep.subr.bf16.mxu0 %v4330_v61 }
0x19ed   :  { %4218 = vmatpush3.bf16.msra.mxu0 %v4217_v25 }
0x1abb   :  { %v3212_v59 = vpop.f32.mrb[38].mxu0 }
0x1abc   :  { %v3933_v28 = vpop.f32.mrb[39].mxu0  ;;  %3943 = vmatmul.mubr.msk.f32.vlgmr.msra.gmra.mrb[40].mxu0 %vm387_vm1, %v3212_v59 }
0x1b8f   :  { %v3296_v36 = vpop.f32.mrb[40].mxu0 }
0x1b90   :  { %v3297_v11 = vadd.f32 %v3411_v29, %v3296_v36  ;;  %v3944_v63 = vpop.f32.mrb[41].mxu0 }
0x1b92   :  { %3301 = vst.msk [vmem:[#allocation2] sm:$0x3] %vm3300_vm4, %v3297_v11 }
0x1b93   :  { %4312 = shalt.err (!%p4309_p4)
}
0x1b94   :  { %s4313_s9 = scalar_lea.hbm %s5308_s21, 32 }
0x1b95   :  { %p4314_p5 = scmp.ne.s32.totalorder %s5308_s21, %s4313_s9  ;;  %p4317_p6 = scmp.lt.u32.totalorder %s4313_s9, %s5308_s21 }
0x1b97   :  { %p4319_p7 = pnand %p4317_p6, %p4314_p5 }
0x1b99   :  { %4322 = shalt.err (!%p4319_p7)
}
0x1b9a   :  { %3311 = dma.vmem_to_hbm [thread:$0]  %s3309_s2, 32, %s5308_s21, [#allocation3]  }
0x1b9b   :  { %4323 = dma.done.wait [#allocation3], 32  }
0x1b9c   :  { %4324 = vsyncadd [#allocation3], 4294967264 }
0x1b9d   :  { %3315 = vsyncpa [#allocation3], 1 }

</bundles_post_ra>
